<compile_context>
chip_gen: v7x
topology: tpu7x:2x2x1
jax: 0.10.0
libtpu: 0.0.40
codegen_flags: <defaults>
</compile_context>

<pallas_src>
import functools

import jax
import jax.numpy as jnp
import numpy as np
from jax.experimental import pallas as pl
from jax.experimental.pallas import tpu as pltpu


def _round_up(x, m):
    return (x + m - 1) // m * m


def _cdiv(a, b):
    return -(-a // b)


def _ffn_kernel(x_ref, xh_ref, m_ref, mh_ref, w1_ref, b1_ref, w2_ref, b2_ref,
                o_ref, *, kernel_size, pad_l, activation):
    """One (batch, T-tile) pair per grid step.

    x_ref : (1, tT, Cin_p)  bf16  main activation block
    xh_ref: (1, Hb, Cin_p)  bf16  right-halo rows (rows [tT, tT+Hb) of the window)
    m_ref : (1, tT, 1)      f32   main mask block
    mh_ref: (1, Hb, 1)      f32   mask halo
    w1_ref: (K, Cin_p, Cf_p) bf16 per-tap conv_1 weight
    b1_ref: (1, Cf_p)  f32
    w2_ref: (K, Cf_p, Cout_p) bf16 per-tap conv_2 weight
    b2_ref: (1, Cout_p) f32
    o_ref : (1, tT, Cout_p) f32
    """
    K = kernel_size
    t_out = o_ref.shape[1]            # tT
    t_h = t_out + (K - 1)             # conv_1 output rows needed by conv_2

    x = x_ref[0]                      # (tT, Cin_p) bf16
    m = m_ref[0]                      # (tT, 1)     f32
    if K > 1:
        # Stitch main block + tiny halo into one window (cheap VMEM copy; halo is
        # only a handful of rows).
        xw = jnp.concatenate([x, xh_ref[0]], axis=0)     # (tT+Hb, Cin_p) bf16
        mw = jnp.concatenate([m, mh_ref[0]], axis=0)     # (tT+Hb, 1)     f32
    else:
        xw, mw = x, m

    # conv_1 input: x * x_mask (mask math in f32, MXU operands bf16).
    xm = (xw * mw).astype(jnp.bfloat16)

    # ---- conv_1: K-tap accumulating MXU matmuls, f32 accumulation ------------
    # NOTE: the shifted row slices may incur small sublane-realignment copies;
    # pltpu.roll (XLU) could hide those, left out for simplicity.
    h = jnp.dot(xm[0:t_h], w1_ref[0], preferred_element_type=jnp.float32)
    for k in range(1, K):
        h = h + jnp.dot(xm[k:k + t_h], w1_ref[k],
                        preferred_element_type=jnp.float32)
    h = h + b1_ref[...]                                  # (t_h, Cf_p) f32

    # ---- activation (f32) -----------------------------------------------------
    if activation == "gelu":
        h = h * jax.nn.sigmoid(1.702 * h)
    else:
        h = jnp.maximum(h, 0.0)
    # dropout: p_dropout == 0.0 at inference -> identity
    # TODO(synk): training-mode dropout (p_dropout > 0) not implemented.

    # ---- conv_2: mask (also zeroes bias-contaminated halo rows), K-tap matmuls
    hm = (h * mw[pad_l:pad_l + t_h]).astype(jnp.bfloat16)
    y = jnp.dot(hm[0:t_out], w2_ref[0], preferred_element_type=jnp.float32)
    for k in range(1, K):
        y = y + jnp.dot(hm[k:k + t_out], w2_ref[k],
                        preferred_element_type=jnp.float32)
    y = y + b2_ref[...]                                  # (t_out, Cout_p) f32

    # ---- final mask + lane-dense store ---------------------------------------
    m_out = mw[2 * pad_l:2 * pad_l + t_out]
    o_ref[0] = (y * m_out).astype(o_ref.dtype)


def ffn_pallas(x_btc, mask_bt1, w1, b1, w2, b2, *, kernel_size, activation=None,
               causal=False, tile_t=1024, min_parallel_steps=2):
    """x_btc: (B, T, Cin), mask_bt1: (B, T, 1).
    w1: (K, Cin, Cf), b1: (Cf,), w2: (K, Cf, Cout), b2: (Cout,).
    Returns (B, T, Cout) f32."""
    B, T, Cin = x_btc.shape
    K = kernel_size
    Cf = w1.shape[2]
    Cout = w2.shape[2]
    pad_l = (K - 1) if causal else (K - 1) // 2
    halo = 2 * (K - 1)                        # halo rows actually used
    Hb = _round_up(max(halo, 1), 16)          # halo block rows (bf16-tile aligned)

    # Lane-dense channel padding (multiples of 128).
    Cin_p = _round_up(Cin, 128)
    Cf_p = _round_up(Cf, 128)
    Cout_p = _round_up(Cout, 128)

    # --- T tiling: multiples of Hb so the halo offset (i+1)*tT is block-aligned.
    tT = _round_up(max(Hb, min(tile_t, _round_up(T, Hb))), Hb)
    # v7x has 2 TensorCores fed via the "parallel" grid axes; make sure there are
    # at least `min_parallel_steps` grid steps before settling on one big tile.
    if B * _cdiv(T, tT) < min_parallel_steps and T > Hb:
        per_batch = _cdiv(min_parallel_steps, B)
        tT = _round_up(_cdiv(T, per_batch), Hb)
    nT = _cdiv(T, tT)
    T_p = nT * tT
    Lp = T_p + Hb                             # padded time length incl. trailing halo

    # --- padded, lane-dense activations in bf16 (mask stays f32) ---------------
    x_pad = jnp.zeros((B, Lp, Cin_p), jnp.bfloat16)
    x_pad = x_pad.at[:, 2 * pad_l:2 * pad_l + T, :Cin].set(x_btc.astype(jnp.bfloat16))
    m_pad = jnp.zeros((B, Lp, 1), jnp.float32)
    m_pad = m_pad.at[:, 2 * pad_l:2 * pad_l + T, :].set(mask_bt1.astype(jnp.float32))

    # --- per-tap, channel-padded bf16 weights / f32 biases ---------------------
    w1_p = jnp.zeros((K, Cin_p, Cf_p), jnp.bfloat16)
    w1_p = w1_p.at[:, :Cin, :Cf].set(w1.astype(jnp.bfloat16))
    w2_p = jnp.zeros((K, Cf_p, Cout_p), jnp.bfloat16)
    w2_p = w2_p.at[:, :Cf, :Cout].set(w2.astype(jnp.bfloat16))
    b1_p = jnp.zeros((1, Cf_p), jnp.float32).at[0, :Cf].set(b1.astype(jnp.float32))
    b2_p = jnp.zeros((1, Cout_p), jnp.float32).at[0, :Cout].set(b2.astype(jnp.float32))

    kernel = functools.partial(_ffn_kernel, kernel_size=K, pad_l=pad_l,
                               activation=activation)

    flops = 2 * B * T_p * K * (Cin_p * Cf_p + Cf_p * Cout_p)
    transcendentals = B * T_p * Cf_p if activation == "gelu" else 0
    bytes_accessed = (B * Lp * Cin_p * 2 + B * nT * Hb * Cin_p * 2    # x main + halo
                      + B * Lp * 4 + B * nT * Hb * 4                  # mask main + halo
                      + w1_p.size * 2 + w2_p.size * 2
                      + b1_p.size * 4 + b2_p.size * 4
                      + B * T_p * Cout_p * 4)                         # output
    cost = pl.CostEstimate(flops=flops, transcendentals=transcendentals,
                           bytes_accessed=bytes_accessed)

    halo_blk = tT // Hb   # halo element offset (i+1)*tT expressed in Hb-sized blocks

    def _run(single_buffer_weights):
        def const_spec(shape):
            zeros = (0,) * len(shape)
            if single_buffer_weights:
                # Constant index map -> DMA'd once; single-buffer to save VMEM.
                return pl.BlockSpec(shape, lambda b, i: zeros,
                                    pipeline_mode=pl.Buffered(1))
            return pl.BlockSpec(shape, lambda b, i: zeros)

        grid_spec = pltpu.PrefetchScalarGridSpec(
            num_scalar_prefetch=0,
            grid=(B, nT),
            in_specs=[
                # Main activation / mask blocks (non-overlapping, blocked index).
                pl.BlockSpec((1, tT, Cin_p), lambda b, i: (b, i, 0)),
                # Right-halo rows of the SAME padded array (tiny block).
                pl.BlockSpec((1, Hb, Cin_p), lambda b, i: (b, (i + 1) * halo_blk, 0)),
                pl.BlockSpec((1, tT, 1), lambda b, i: (b, i, 0)),
                pl.BlockSpec((1, Hb, 1), lambda b, i: (b, (i + 1) * halo_blk, 0)),
                const_spec((K, Cin_p, Cf_p)),
                const_spec((1, Cf_p)),
                const_spec((K, Cf_p, Cout_p)),
                const_spec((1, Cout_p)),
            ],
            out_specs=pl.BlockSpec((1, tT, Cout_p), lambda b, i: (b, i, 0)),
        )
        return pl.pallas_call(
            kernel,
            out_shape=jax.ShapeDtypeStruct((B, T_p, Cout_p), jnp.float32),
            grid_spec=grid_spec,
            compiler_params=pltpu.CompilerParams(
                dimension_semantics=("parallel", "parallel"),
                vmem_limit_bytes=48 * 1024 * 1024),
            cost_estimate=cost,
        )(x_pad, x_pad, m_pad, m_pad, w1_p, b1_p, w2_p, b2_p)

    try:
        out_p = _run(True)
    except Exception:
        # This Pallas build rejected pl.Buffered(1); fall back to default buffering.
        out_p = _run(False)

    # NOTE: downstream consumers that accept the padded (B, T_p, Cout_p) slab can
    # take `out_p` directly and skip this extra HBM copy.
    return out_p[:, :T, :Cout]


def ffn_reference(x_btc, mask_bt1, w1, b1, w2, b2, *,
                  kernel_size, activation=None, causal=False):
    """Pure-JAX f32 reference mirroring the PyTorch forward (for verification)."""
    K = kernel_size
    pad_l = (K - 1) if causal else (K - 1) // 2
    pad_r = (K - 1) - pad_l

    def conv(x, w, b):  # x: (B, T, C), w: (K, C, Cf)
        xp = jnp.pad(x, ((0, 0), (pad_l, pad_r), (0, 0)))
        T = x.shape[1]
        out = b[None, None, :]
        for k in range(K):
            out = out + jnp.einsum("btc,cf->btf", xp[:, k:k + T, :], w[k])
        return out

    h = conv(x_btc * mask_bt1, w1, b1)
    if activation == "gelu":
        h = h * jax.nn.sigmoid(1.702 * h)
    else:
        h = jnp.maximum(h, 0.0)
    y = conv(h * mask_bt1, w2, b2)
    return y * mask_bt1


if __name__ == "__main__":
    # Module config (matches FFN.__init__): small synthetic sizes.
    in_channels, out_channels, filter_channels = 8, 8, 16
    kernel_size = 3
    B, T = 2, 16

    key = jax.random.PRNGKey(0)
    k_x, k_w1, k_b1, k_w2, k_b2 = jax.random.split(key, 5)

    # Inputs in PyTorch layout (B, C, T) / (B, 1, T), then moved to (B, T, C).
    x_bct = jax.random.normal(k_x, (B, in_channels, T), dtype=jnp.float32)
    # mask: first sequence fully valid, second sequence half valid.
    mask_np = np.ones((B, 1, T), dtype=np.float32)
    mask_np[1, 0, T // 2:] = 0.0
    mask_b1t = jnp.asarray(mask_np)

    x_btc = jnp.transpose(x_bct, (0, 2, 1))          # (B, T, Cin)
    mask_bt1 = jnp.transpose(mask_b1t, (0, 2, 1))    # (B, T, 1)

    # Deterministic parameter init (Conv1d weights stored as (K, Cin, Cout)).
    scale1 = 1.0 / np.sqrt(in_channels * kernel_size)
    scale2 = 1.0 / np.sqrt(filter_channels * kernel_size)
    w1 = jax.random.uniform(k_w1, (kernel_size, in_channels, filter_channels),
                            minval=-scale1, maxval=scale1, dtype=jnp.float32)
    b1 = jax.random.uniform(k_b1, (filter_channels,),
                            minval=-scale1, maxval=scale1, dtype=jnp.float32)
    w2 = jax.random.uniform(k_w2, (kernel_size, filter_channels, out_channels),
                            minval=-scale2, maxval=scale2, dtype=jnp.float32)
    b2 = jax.random.uniform(k_b2, (out_channels,),
                            minval=-scale2, maxval=scale2, dtype=jnp.float32)

    # Check both the default (relu / same-padding) and gelu / causal paths.
    for act, causal in ((None, False), ("gelu", True)):
        out = ffn_pallas(x_btc, mask_bt1, w1, b1, w2, b2,
                         kernel_size=kernel_size, activation=act, causal=causal)
        out = jax.block_until_ready(out)
        ref = ffn_reference(x_btc, mask_bt1, w1, b1, w2, b2,
                            kernel_size=kernel_size, activation=act, causal=causal)
        # bf16 matmul operands/activations vs f32 reference -> loosened tolerance.
        np.testing.assert_allclose(np.asarray(out), np.asarray(ref),
                                   rtol=5e-2, atol=5e-2)

    print("KERNEL_OK")
</pallas_src>

<mosaic_0001>
module attributes {stable_mosaic.version = 11 : i64} {
  func.func @_ffn_kernel(%arg0: i32, %arg1: i32, %arg2: memref<1x16x128xbf16, #tpu.memory_space<vmem>>, %arg3: memref<1x16x128xbf16, #tpu.memory_space<vmem>>, %arg4: memref<1x16x1xf32, #tpu.memory_space<vmem>>, %arg5: memref<1x16x1xf32, #tpu.memory_space<vmem>>, %arg6: memref<3x128x128xbf16, #tpu.memory_space<vmem>>, %arg7: memref<1x128xf32, #tpu.memory_space<vmem>>, %arg8: memref<3x128x128xbf16, #tpu.memory_space<vmem>>, %arg9: memref<1x128xf32, #tpu.memory_space<vmem>>, %arg10: memref<1x16x128xf32, #tpu.memory_space<vmem>>) attributes {dimension_semantics = [#tpu.dimension_semantics<parallel>, #tpu.dimension_semantics<parallel>], iteration_bounds = array<i64: 2, 1>, scalar_prefetch = 0 : i64, scratch_operands = 0 : i64, tpu.core_type = #tpu.core_type<tc>, window_params = [{transform_indices = @transform_0, window_bounds = array<i64: 1, 16, 128>}, {transform_indices = @transform_1, window_bounds = array<i64: 1, 16, 128>}, {transform_indices = @transform_2, window_bounds = array<i64: 1, 16, 1>}, {transform_indices = @transform_3, window_bounds = array<i64: 1, 16, 1>}, {pipeline_mode = #tpu.pipeline_mode<synchronous>, transform_indices = @transform_4, window_bounds = array<i64: 3, 128, 128>}, {pipeline_mode = #tpu.pipeline_mode<synchronous>, transform_indices = @transform_5, window_bounds = array<i64: 1, 128>}, {pipeline_mode = #tpu.pipeline_mode<synchronous>, transform_indices = @transform_6, window_bounds = array<i64: 3, 128, 128>}, {pipeline_mode = #tpu.pipeline_mode<synchronous>, transform_indices = @transform_7, window_bounds = array<i64: 1, 128>}, {transform_indices = @transform_8, window_bounds = array<i64: 1, 16, 128>}]} {
    %c0 = arith.constant 0 : index
    %c0_0 = arith.constant 0 : index
    %c0_1 = arith.constant 0 : index
    %0 = vector.load %arg2[%c0, %c0_0, %c0_1] : memref<1x16x128xbf16, #tpu.memory_space<vmem>>, vector<1x16x128xbf16>
    %1 = vector.shape_cast %0 : vector<1x16x128xbf16> to vector<16x128xbf16>
    %c0_2 = arith.constant 0 : index
    %c0_3 = arith.constant 0 : index
    %c0_4 = arith.constant 0 : index
    %2 = vector.load %arg4[%c0_2, %c0_3, %c0_4] : memref<1x16x1xf32, #tpu.memory_space<vmem>>, vector<1x16x1xf32>
    %3 = vector.shape_cast %2 : vector<1x16x1xf32> to vector<16x1xf32>
    %c0_5 = arith.constant 0 : index
    %c0_6 = arith.constant 0 : index
    %c0_7 = arith.constant 0 : index
    %4 = vector.load %arg3[%c0_5, %c0_6, %c0_7] : memref<1x16x128xbf16, #tpu.memory_space<vmem>>, vector<1x16x128xbf16>
    %5 = vector.shape_cast %4 : vector<1x16x128xbf16> to vector<16x128xbf16>
    %6 = tpu.concatenate %1, %5 in 0 : vector<16x128xbf16>, vector<16x128xbf16> -> vector<32x128xbf16>
    %c0_8 = arith.constant 0 : index
    %c0_9 = arith.constant 0 : index
    %c0_10 = arith.constant 0 : index
    %7 = vector.load %arg5[%c0_8, %c0_9, %c0_10] : memref<1x16x1xf32, #tpu.memory_space<vmem>>, vector<1x16x1xf32>
    %8 = vector.shape_cast %7 : vector<1x16x1xf32> to vector<16x1xf32>
    %9 = tpu.concatenate %3, %8 in 0 : vector<16x1xf32>, vector<16x1xf32> -> vector<32x1xf32>
    %10 = arith.extf %6 : vector<32x128xbf16> to vector<32x128xf32>
    %11 = vector.broadcast %9 : vector<32x1xf32> to vector<32x128xf32>
    %12 = arith.mulf %10, %11 : vector<32x128xf32>
    %13 = arith.truncf %12 : vector<32x128xf32> to vector<32x128xbf16>
    %14 = vector.extract_strided_slice %13 {offsets = [0, 0], sizes = [18, 128], strides = [1, 1]} : vector<32x128xbf16> to vector<18x128xbf16>
    %c0_11 = arith.constant 0 : index
    %c0_12 = arith.constant 0 : index
    %c0_13 = arith.constant 0 : index
    %15 = vector.load %arg6[%c0_11, %c0_12, %c0_13] : memref<3x128x128xbf16, #tpu.memory_space<vmem>>, vector<1x128x128xbf16>
    %16 = vector.shape_cast %15 : vector<1x128x128xbf16> to vector<128x128xbf16>
    %cst = arith.constant dense<0.000000e+00> : vector<18x128xf32>
    %17 = tpu.matmul %14, %16, %cst {dimension_numbers = #tpu.dot_dimension_numbers<[1], [0], [0], [1], [0, 0, 1, 1], [], []>} : vector<18x128xbf16>, vector<128x128xbf16>, vector<18x128xf32> -> vector<18x128xf32>
    %18 = vector.extract_strided_slice %13 {offsets = [1, 0], sizes = [18, 128], strides = [1, 1]} : vector<32x128xbf16> to vector<18x128xbf16>
    %c1 = arith.constant 1 : index
    %c0_14 = arith.constant 0 : index
    %c0_15 = arith.constant 0 : index
    %19 = vector.load %arg6[%c1, %c0_14, %c0_15] : memref<3x128x128xbf16, #tpu.memory_space<vmem>>, vector<1x128x128xbf16>
    %20 = vector.shape_cast %19 : vector<1x128x128xbf16> to vector<128x128xbf16>
    %cst_16 = arith.constant dense<0.000000e+00> : vector<18x128xf32>
    %21 = tpu.matmul %18, %20, %cst_16 {dimension_numbers = #tpu.dot_dimension_numbers<[1], [0], [0], [1], [0, 0, 1, 1], [], []>} : vector<18x128xbf16>, vector<128x128xbf16>, vector<18x128xf32> -> vector<18x128xf32>
    %22 = arith.addf %17, %21 : vector<18x128xf32>
    %23 = vector.extract_strided_slice %13 {offsets = [2, 0], sizes = [18, 128], strides = [1, 1]} : vector<32x128xbf16> to vector<18x128xbf16>
    %c2 = arith.constant 2 : index
    %c0_17 = arith.constant 0 : index
    %c0_18 = arith.constant 0 : index
    %24 = vector.load %arg6[%c2, %c0_17, %c0_18] : memref<3x128x128xbf16, #tpu.memory_space<vmem>>, vector<1x128x128xbf16>
    %25 = vector.shape_cast %24 : vector<1x128x128xbf16> to vector<128x128xbf16>
    %cst_19 = arith.constant dense<0.000000e+00> : vector<18x128xf32>
    %26 = tpu.matmul %23, %25, %cst_19 {dimension_numbers = #tpu.dot_dimension_numbers<[1], [0], [0], [1], [0, 0, 1, 1], [], []>} : vector<18x128xbf16>, vector<128x128xbf16>, vector<18x128xf32> -> vector<18x128xf32>
    %27 = arith.addf %22, %26 : vector<18x128xf32>
    %c0_20 = arith.constant 0 : index
    %c0_21 = arith.constant 0 : index
    %28 = vector.load %arg7[%c0_20, %c0_21] : memref<1x128xf32, #tpu.memory_space<vmem>>, vector<1x128xf32>
    %29 = vector.broadcast %28 : vector<1x128xf32> to vector<18x128xf32>
    %30 = arith.addf %27, %29 : vector<18x128xf32>
    %cst_22 = arith.constant 0.000000e+00 : f32
    %31 = vector.broadcast %cst_22 : f32 to vector<18x128xf32>
    %32 = arith.maximumf %30, %31 : vector<18x128xf32>
    %33 = vector.extract_strided_slice %9 {offsets = [1, 0], sizes = [18, 1], strides = [1, 1]} : vector<32x1xf32> to vector<18x1xf32>
    %34 = vector.broadcast %33 : vector<18x1xf32> to vector<18x128xf32>
    %35 = arith.mulf %32, %34 : vector<18x128xf32>
    %36 = arith.truncf %35 : vector<18x128xf32> to vector<18x128xbf16>
    %37 = vector.extract_strided_slice %36 {offsets = [0, 0], sizes = [16, 128], strides = [1, 1]} : vector<18x128xbf16> to vector<16x128xbf16>
    %c0_23 = arith.constant 0 : index
    %c0_24 = arith.constant 0 : index
    %c0_25 = arith.constant 0 : index
    %38 = vector.load %arg8[%c0_23, %c0_24, %c0_25] : memref<3x128x128xbf16, #tpu.memory_space<vmem>>, vector<1x128x128xbf16>
    %39 = vector.shape_cast %38 : vector<1x128x128xbf16> to vector<128x128xbf16>
    %cst_26 = arith.constant dense<0.000000e+00> : vector<16x128xf32>
    %40 = tpu.matmul %37, %39, %cst_26 {dimension_numbers = #tpu.dot_dimension_numbers<[1], [0], [0], [1], [0, 0, 1, 1], [], []>} : vector<16x128xbf16>, vector<128x128xbf16>, vector<16x128xf32> -> vector<16x128xf32>
    %41 = vector.extract_strided_slice %36 {offsets = [1, 0], sizes = [16, 128], strides = [1, 1]} : vector<18x128xbf16> to vector<16x128xbf16>
    %c1_27 = arith.constant 1 : index
    %c0_28 = arith.constant 0 : index
    %c0_29 = arith.constant 0 : index
    %42 = vector.load %arg8[%c1_27, %c0_28, %c0_29] : memref<3x128x128xbf16, #tpu.memory_space<vmem>>, vector<1x128x128xbf16>
    %43 = vector.shape_cast %42 : vector<1x128x128xbf16> to vector<128x128xbf16>
    %cst_30 = arith.constant dense<0.000000e+00> : vector<16x128xf32>
    %44 = tpu.matmul %41, %43, %cst_30 {dimension_numbers = #tpu.dot_dimension_numbers<[1], [0], [0], [1], [0, 0, 1, 1], [], []>} : vector<16x128xbf16>, vector<128x128xbf16>, vector<16x128xf32> -> vector<16x128xf32>
    %45 = arith.addf %40, %44 : vector<16x128xf32>
    %46 = vector.extract_strided_slice %36 {offsets = [2, 0], sizes = [16, 128], strides = [1, 1]} : vector<18x128xbf16> to vector<16x128xbf16>
    %c2_31 = arith.constant 2 : index
    %c0_32 = arith.constant 0 : index
    %c0_33 = arith.constant 0 : index
    %47 = vector.load %arg8[%c2_31, %c0_32, %c0_33] : memref<3x128x128xbf16, #tpu.memory_space<vmem>>, vector<1x128x128xbf16>
    %48 = vector.shape_cast %47 : vector<1x128x128xbf16> to vector<128x128xbf16>
    %cst_34 = arith.constant dense<0.000000e+00> : vector<16x128xf32>
    %49 = tpu.matmul %46, %48, %cst_34 {dimension_numbers = #tpu.dot_dimension_numbers<[1], [0], [0], [1], [0, 0, 1, 1], [], []>} : vector<16x128xbf16>, vector<128x128xbf16>, vector<16x128xf32> -> vector<16x128xf32>
    %50 = arith.addf %45, %49 : vector<16x128xf32>
    %c0_35 = arith.constant 0 : index
    %c0_36 = arith.constant 0 : index
    %51 = vector.load %arg9[%c0_35, %c0_36] : memref<1x128xf32, #tpu.memory_space<vmem>>, vector<1x128xf32>
    %52 = vector.broadcast %51 : vector<1x128xf32> to vector<16x128xf32>
    %53 = arith.addf %50, %52 : vector<16x128xf32>
    %54 = vector.extract_strided_slice %9 {offsets = [2, 0], sizes = [16, 1], strides = [1, 1]} : vector<32x1xf32> to vector<16x1xf32>
    %55 = vector.broadcast %54 : vector<16x1xf32> to vector<16x128xf32>
    %56 = arith.mulf %53, %55 : vector<16x128xf32>
    %c0_37 = arith.constant 0 : index
    %c0_38 = arith.constant 0 : index
    %c0_39 = arith.constant 0 : index
    %57 = vector.load %arg10[%c0_37, %c0_38, %c0_39] : memref<1x16x128xf32, #tpu.memory_space<vmem>>, vector<1x16x128xf32>
    %58 = vector.shape_cast %57 : vector<1x16x128xf32> to vector<16x128xf32>
    %59 = vector.shape_cast %56 : vector<16x128xf32> to vector<1x16x128xf32>
    tpu.vector_store %arg10[%c0_37, %c0_38, %c0_39], %59 {strides = array<i32>} : memref<1x16x128xf32, #tpu.memory_space<vmem>>, vector<1x16x128xf32>,
    return
  }
  func.func @transform_0(%arg0: i32, %arg1: i32) -> (i32, i32, i32) {
    %c0_i32 = arith.constant 0 : i32
    %c0_i32_0 = arith.constant 0 : i32
    return %arg0, %arg1, %c0_i32 : i32, i32, i32
  }
  func.func @transform_1(%arg0: i32, %arg1: i32) -> (i32, i32, i32) {
    %c1_i32 = arith.constant 1 : i32
    %0 = arith.addi %arg1, %c1_i32 : i32
    %c1_i32_0 = arith.constant 1 : i32
    %1 = arith.muli %0, %c1_i32_0 : i32
    %c0_i32 = arith.constant 0 : i32
    %c0_i32_1 = arith.constant 0 : i32
    return %arg0, %1, %c0_i32 : i32, i32, i32
  }
  func.func @transform_2(%arg0: i32, %arg1: i32) -> (i32, i32, i32) {
    %c0_i32 = arith.constant 0 : i32
    %c0_i32_0 = arith.constant 0 : i32
    return %arg0, %arg1, %c0_i32 : i32, i32, i32
  }
  func.func @transform_3(%arg0: i32, %arg1: i32) -> (i32, i32, i32) {
    %c1_i32 = arith.constant 1 : i32
    %0 = arith.addi %arg1, %c1_i32 : i32
    %c1_i32_0 = arith.constant 1 : i32
    %1 = arith.muli %0, %c1_i32_0 : i32
    %c0_i32 = arith.constant 0 : i32
    %c0_i32_1 = arith.constant 0 : i32
    return %arg0, %1, %c0_i32 : i32, i32, i32
  }
  func.func @transform_4(%arg0: i32, %arg1: i32) -> (i32, i32, i32) {
    %c0_i32 = arith.constant 0 : i32
    %c0_i32_0 = arith.constant 0 : i32
    %c0_i32_1 = arith.constant 0 : i32
    %c0_i32_2 = arith.constant 0 : i32
    return %c0_i32, %c0_i32_0, %c0_i32_1 : i32, i32, i32
  }
  func.func @transform_5(%arg0: i32, %arg1: i32) -> (i32, i32) {
    %c0_i32 = arith.constant 0 : i32
    %c0_i32_0 = arith.constant 0 : i32
    %c0_i32_1 = arith.constant 0 : i32
    return %c0_i32, %c0_i32_0 : i32, i32
  }
  func.func @transform_6(%arg0: i32, %arg1: i32) -> (i32, i32, i32) {
    %c0_i32 = arith.constant 0 : i32
    %c0_i32_0 = arith.constant 0 : i32
    %c0_i32_1 = arith.constant 0 : i32
    %c0_i32_2 = arith.constant 0 : i32
    return %c0_i32, %c0_i32_0, %c0_i32_1 : i32, i32, i32
  }
  func.func @transform_7(%arg0: i32, %arg1: i32) -> (i32, i32) {
    %c0_i32 = arith.constant 0 : i32
    %c0_i32_0 = arith.constant 0 : i32
    %c0_i32_1 = arith.constant 0 : i32
    return %c0_i32, %c0_i32_0 : i32, i32
  }
  func.func @transform_8(%arg0: i32, %arg1: i32) -> (i32, i32, i32) {
    %c0_i32 = arith.constant 0 : i32
    %c0_i32_0 = arith.constant 0 : i32
    return %arg0, %arg1, %c0_i32 : i32, i32, i32
  }
}

module attributes {stable_mosaic.version = 11 : i64} {
  func.func @_ffn_kernel(%arg0: i32, %arg1: i32, %arg2: memref<1x16x128xbf16, #tpu.memory_space<vmem>>, %arg3: memref<1x16x128xbf16, #tpu.memory_space<vmem>>, %arg4: memref<1x16x1xf32, #tpu.memory_space<vmem>>, %arg5: memref<1x16x1xf32, #tpu.memory_space<vmem>>, %arg6: memref<3x128x128xbf16, #tpu.memory_space<vmem>>, %arg7: memref<1x128xf32, #tpu.memory_space<vmem>>, %arg8: memref<3x128x128xbf16, #tpu.memory_space<vmem>>, %arg9: memref<1x128xf32, #tpu.memory_space<vmem>>, %arg10: memref<1x16x128xf32, #tpu.memory_space<vmem>>) attributes {dimension_semantics = [#tpu.dimension_semantics<parallel>, #tpu.dimension_semantics<parallel>], iteration_bounds = array<i64: 2, 1>, scalar_prefetch = 0 : i64, scratch_operands = 0 : i64, tpu.core_type = #tpu.core_type<tc>, window_params = [{transform_indices = @transform_0, window_bounds = array<i64: 1, 16, 128>}, {transform_indices = @transform_1, window_bounds = array<i64: 1, 16, 128>}, {transform_indices = @transform_2, window_bounds = array<i64: 1, 16, 1>}, {transform_indices = @transform_3, window_bounds = array<i64: 1, 16, 1>}, {pipeline_mode = #tpu.pipeline_mode<synchronous>, transform_indices = @transform_4, window_bounds = array<i64: 3, 128, 128>}, {pipeline_mode = #tpu.pipeline_mode<synchronous>, transform_indices = @transform_5, window_bounds = array<i64: 1, 128>}, {pipeline_mode = #tpu.pipeline_mode<synchronous>, transform_indices = @transform_6, window_bounds = array<i64: 3, 128, 128>}, {pipeline_mode = #tpu.pipeline_mode<synchronous>, transform_indices = @transform_7, window_bounds = array<i64: 1, 128>}, {transform_indices = @transform_8, window_bounds = array<i64: 1, 16, 128>}]} {
    %c0 = arith.constant 0 : index
    %c0_0 = arith.constant 0 : index
    %c0_1 = arith.constant 0 : index
    %0 = vector.load %arg2[%c0, %c0_0, %c0_1] : memref<1x16x128xbf16, #tpu.memory_space<vmem>>, vector<1x16x128xbf16>
    %1 = vector.shape_cast %0 : vector<1x16x128xbf16> to vector<16x128xbf16>
    %c0_2 = arith.constant 0 : index
    %c0_3 = arith.constant 0 : index
    %c0_4 = arith.constant 0 : index
    %2 = vector.load %arg4[%c0_2, %c0_3, %c0_4] : memref<1x16x1xf32, #tpu.memory_space<vmem>>, vector<1x16x1xf32>
    %3 = vector.shape_cast %2 : vector<1x16x1xf32> to vector<16x1xf32>
    %c0_5 = arith.constant 0 : index
    %c0_6 = arith.constant 0 : index
    %c0_7 = arith.constant 0 : index
    %4 = vector.load %arg3[%c0_5, %c0_6, %c0_7] : memref<1x16x128xbf16, #tpu.memory_space<vmem>>, vector<1x16x128xbf16>
    %5 = vector.shape_cast %4 : vector<1x16x128xbf16> to vector<16x128xbf16>
    %6 = tpu.concatenate %1, %5 in 0 : vector<16x128xbf16>, vector<16x128xbf16> -> vector<32x128xbf16>
    %c0_8 = arith.constant 0 : index
    %c0_9 = arith.constant 0 : index
    %c0_10 = arith.constant 0 : index
    %7 = vector.load %arg5[%c0_8, %c0_9, %c0_10] : memref<1x16x1xf32, #tpu.memory_space<vmem>>, vector<1x16x1xf32>
    %8 = vector.shape_cast %7 : vector<1x16x1xf32> to vector<16x1xf32>
    %9 = tpu.concatenate %3, %8 in 0 : vector<16x1xf32>, vector<16x1xf32> -> vector<32x1xf32>
    %10 = arith.extf %6 : vector<32x128xbf16> to vector<32x128xf32>
    %11 = vector.broadcast %9 : vector<32x1xf32> to vector<32x128xf32>
    %12 = arith.mulf %10, %11 : vector<32x128xf32>
    %13 = arith.truncf %12 : vector<32x128xf32> to vector<32x128xbf16>
    %14 = vector.extract_strided_slice %13 {offsets = [0, 0], sizes = [18, 128], strides = [1, 1]} : vector<32x128xbf16> to vector<18x128xbf16>
    %c0_11 = arith.constant 0 : index
    %c0_12 = arith.constant 0 : index
    %c0_13 = arith.constant 0 : index
    %15 = vector.load %arg6[%c0_11, %c0_12, %c0_13] : memref<3x128x128xbf16, #tpu.memory_space<vmem>>, vector<1x128x128xbf16>
    %16 = vector.shape_cast %15 : vector<1x128x128xbf16> to vector<128x128xbf16>
    %cst = arith.constant dense<0.000000e+00> : vector<18x128xf32>
    %17 = tpu.matmul %14, %16, %cst {dimension_numbers = #tpu.dot_dimension_numbers<[1], [0], [0], [1], [0, 0, 1, 1], [], []>} : vector<18x128xbf16>, vector<128x128xbf16>, vector<18x128xf32> -> vector<18x128xf32>
    %18 = vector.extract_strided_slice %13 {offsets = [1, 0], sizes = [18, 128], strides = [1, 1]} : vector<32x128xbf16> to vector<18x128xbf16>
    %c1 = arith.constant 1 : index
    %c0_14 = arith.constant 0 : index
    %c0_15 = arith.constant 0 : index
    %19 = vector.load %arg6[%c1, %c0_14, %c0_15] : memref<3x128x128xbf16, #tpu.memory_space<vmem>>, vector<1x128x128xbf16>
    %20 = vector.shape_cast %19 : vector<1x128x128xbf16> to vector<128x128xbf16>
    %cst_16 = arith.constant dense<0.000000e+00> : vector<18x128xf32>
    %21 = tpu.matmul %18, %20, %cst_16 {dimension_numbers = #tpu.dot_dimension_numbers<[1], [0], [0], [1], [0, 0, 1, 1], [], []>} : vector<18x128xbf16>, vector<128x128xbf16>, vector<18x128xf32> -> vector<18x128xf32>
    %22 = arith.addf %17, %21 : vector<18x128xf32>
    %23 = vector.extract_strided_slice %13 {offsets = [2, 0], sizes = [18, 128], strides = [1, 1]} : vector<32x128xbf16> to vector<18x128xbf16>
    %c2 = arith.constant 2 : index
    %c0_17 = arith.constant 0 : index
    %c0_18 = arith.constant 0 : index
    %24 = vector.load %arg6[%c2, %c0_17, %c0_18] : memref<3x128x128xbf16, #tpu.memory_space<vmem>>, vector<1x128x128xbf16>
    %25 = vector.shape_cast %24 : vector<1x128x128xbf16> to vector<128x128xbf16>
    %cst_19 = arith.constant dense<0.000000e+00> : vector<18x128xf32>
    %26 = tpu.matmul %23, %25, %cst_19 {dimension_numbers = #tpu.dot_dimension_numbers<[1], [0], [0], [1], [0, 0, 1, 1], [], []>} : vector<18x128xbf16>, vector<128x128xbf16>, vector<18x128xf32> -> vector<18x128xf32>
    %27 = arith.addf %22, %26 : vector<18x128xf32>
    %c0_20 = arith.constant 0 : index
    %c0_21 = arith.constant 0 : index
    %28 = vector.load %arg7[%c0_20, %c0_21] : memref<1x128xf32, #tpu.memory_space<vmem>>, vector<1x128xf32>
    %29 = vector.broadcast %28 : vector<1x128xf32> to vector<18x128xf32>
    %30 = arith.addf %27, %29 : vector<18x128xf32>
    %cst_22 = arith.constant 0.000000e+00 : f32
    %31 = vector.broadcast %cst_22 : f32 to vector<18x128xf32>
    %32 = arith.maximumf %30, %31 : vector<18x128xf32>
    %33 = vector.extract_strided_slice %9 {offsets = [1, 0], sizes = [18, 1], strides = [1, 1]} : vector<32x1xf32> to vector<18x1xf32>
    %34 = vector.broadcast %33 : vector<18x1xf32> to vector<18x128xf32>
    %35 = arith.mulf %32, %34 : vector<18x128xf32>
    %36 = arith.truncf %35 : vector<18x128xf32> to vector<18x128xbf16>
    %37 = vector.extract_strided_slice %36 {offsets = [0, 0], sizes = [16, 128], strides = [1, 1]} : vector<18x128xbf16> to vector<16x128xbf16>
    %c0_23 = arith.constant 0 : index
    %c0_24 = arith.constant 0 : index
    %c0_25 = arith.constant 0 : index
    %38 = vector.load %arg8[%c0_23, %c0_24, %c0_25] : memref<3x128x128xbf16, #tpu.memory_space<vmem>>, vector<1x128x128xbf16>
    %39 = vector.shape_cast %38 : vector<1x128x128xbf16> to vector<128x128xbf16>
    %cst_26 = arith.constant dense<0.000000e+00> : vector<16x128xf32>
    %40 = tpu.matmul %37, %39, %cst_26 {dimension_numbers = #tpu.dot_dimension_numbers<[1], [0], [0], [1], [0, 0, 1, 1], [], []>} : vector<16x128xbf16>, vector<128x128xbf16>, vector<16x128xf32> -> vector<16x128xf32>
    %41 = vector.extract_strided_slice %36 {offsets = [1, 0], sizes = [16, 128], strides = [1, 1]} : vector<18x128xbf16> to vector<16x128xbf16>
    %c1_27 = arith.constant 1 : index
    %c0_28 = arith.constant 0 : index
    %c0_29 = arith.constant 0 : index
    %42 = vector.load %arg8[%c1_27, %c0_28, %c0_29] : memref<3x128x128xbf16, #tpu.memory_space<vmem>>, vector<1x128x128xbf16>
    %43 = vector.shape_cast %42 : vector<1x128x128xbf16> to vector<128x128xbf16>
    %cst_30 = arith.constant dense<0.000000e+00> : vector<16x128xf32>
    %44 = tpu.matmul %41, %43, %cst_30 {dimension_numbers = #tpu.dot_dimension_numbers<[1], [0], [0], [1], [0, 0, 1, 1], [], []>} : vector<16x128xbf16>, vector<128x128xbf16>, vector<16x128xf32> -> vector<16x128xf32>
    %45 = arith.addf %40, %44 : vector<16x128xf32>
    %46 = vector.extract_strided_slice %36 {offsets = [2, 0], sizes = [16, 128], strides = [1, 1]} : vector<18x128xbf16> to vector<16x128xbf16>
    %c2_31 = arith.constant 2 : index
    %c0_32 = arith.constant 0 : index
    %c0_33 = arith.constant 0 : index
    %47 = vector.load %arg8[%c2_31, %c0_32, %c0_33] : memref<3x128x128xbf16, #tpu.memory_space<vmem>>, vector<1x128x128xbf16>
    %48 = vector.shape_cast %47 : vector<1x128x128xbf16> to vector<128x128xbf16>
    %cst_34 = arith.constant dense<0.000000e+00> : vector<16x128xf32>
    %49 = tpu.matmul %46, %48, %cst_34 {dimension_numbers = #tpu.dot_dimension_numbers<[1], [0], [0], [1], [0, 0, 1, 1], [], []>} : vector<16x128xbf16>, vector<128x128xbf16>, vector<16x128xf32> -> vector<16x128xf32>
    %50 = arith.addf %45, %49 : vector<16x128xf32>
    %c0_35 = arith.constant 0 : index
    %c0_36 = arith.constant 0 : index
    %51 = vector.load %arg9[%c0_35, %c0_36] : memref<1x128xf32, #tpu.memory_space<vmem>>, vector<1x128xf32>
    %52 = vector.broadcast %51 : vector<1x128xf32> to vector<16x128xf32>
    %53 = arith.addf %50, %52 : vector<16x128xf32>
    %54 = vector.extract_strided_slice %9 {offsets = [2, 0], sizes = [16, 1], strides = [1, 1]} : vector<32x1xf32> to vector<16x1xf32>
    %55 = vector.broadcast %54 : vector<16x1xf32> to vector<16x128xf32>
    %56 = arith.mulf %53, %55 : vector<16x128xf32>
    %c0_37 = arith.constant 0 : index
    %c0_38 = arith.constant 0 : index
    %c0_39 = arith.constant 0 : index
    %57 = vector.load %arg10[%c0_37, %c0_38, %c0_39] : memref<1x16x128xf32, #tpu.memory_space<vmem>>, vector<1x16x128xf32>
    %58 = vector.shape_cast %57 : vector<1x16x128xf32> to vector<16x128xf32>
    %59 = vector.shape_cast %56 : vector<16x128xf32> to vector<1x16x128xf32>
    tpu.vector_store %arg10[%c0_37, %c0_38, %c0_39], %59 {strides = array<i32>} : memref<1x16x128xf32, #tpu.memory_space<vmem>>, vector<1x16x128xf32>,
    return
  }
  func.func @transform_0(%arg0: i32, %arg1: i32) -> (i32, i32, i32) {
    %c0_i32 = arith.constant 0 : i32
    %c0_i32_0 = arith.constant 0 : i32
    return %arg0, %arg1, %c0_i32 : i32, i32, i32
  }
  func.func @transform_1(%arg0: i32, %arg1: i32) -> (i32, i32, i32) {
    %c1_i32 = arith.constant 1 : i32
    %0 = arith.addi %arg1, %c1_i32 : i32
    %c1_i32_0 = arith.constant 1 : i32
    %1 = arith.muli %0, %c1_i32_0 : i32
    %c0_i32 = arith.constant 0 : i32
    %c0_i32_1 = arith.constant 0 : i32
    return %arg0, %1, %c0_i32 : i32, i32, i32
  }
  func.func @transform_2(%arg0: i32, %arg1: i32) -> (i32, i32, i32) {
    %c0_i32 = arith.constant 0 : i32
    %c0_i32_0 = arith.constant 0 : i32
    return %arg0, %arg1, %c0_i32 : i32, i32, i32
  }
  func.func @transform_3(%arg0: i32, %arg1: i32) -> (i32, i32, i32) {
    %c1_i32 = arith.constant 1 : i32
    %0 = arith.addi %arg1, %c1_i32 : i32
    %c1_i32_0 = arith.constant 1 : i32
    %1 = arith.muli %0, %c1_i32_0 : i32
    %c0_i32 = arith.constant 0 : i32
    %c0_i32_1 = arith.constant 0 : i32
    return %arg0, %1, %c0_i32 : i32, i32, i32
  }
  func.func @transform_4(%arg0: i32, %arg1: i32) -> (i32, i32, i32) {
    %c0_i32 = arith.constant 0 : i32
    %c0_i32_0 = arith.constant 0 : i32
    %c0_i32_1 = arith.constant 0 : i32
    %c0_i32_2 = arith.constant 0 : i32
    return %c0_i32, %c0_i32_0, %c0_i32_1 : i32, i32, i32
  }
  func.func @transform_5(%arg0: i32, %arg1: i32) -> (i32, i32) {
    %c0_i32 = arith.constant 0 : i32
    %c0_i32_0 = arith.constant 0 : i32
    %c0_i32_1 = arith.constant 0 : i32
    return %c0_i32, %c0_i32_0 : i32, i32
  }
  func.func @transform_6(%arg0: i32, %arg1: i32) -> (i32, i32, i32) {
    %c0_i32 = arith.constant 0 : i32
    %c0_i32_0 = arith.constant 0 : i32
    %c0_i32_1 = arith.constant 0 : i32
    %c0_i32_2 = arith.constant 0 : i32
    return %c0_i32, %c0_i32_0, %c0_i32_1 : i32, i32, i32
  }
  func.func @transform_7(%arg0: i32, %arg1: i32) -> (i32, i32) {
    %c0_i32 = arith.constant 0 : i32
    %c0_i32_0 = arith.constant 0 : i32
    %c0_i32_1 = arith.constant 0 : i32
    return %c0_i32, %c0_i32_0 : i32, i32
  }
  func.func @transform_8(%arg0: i32, %arg1: i32) -> (i32, i32, i32) {
    %c0_i32 = arith.constant 0 : i32
    %c0_i32_0 = arith.constant 0 : i32
    return %arg0, %arg1, %c0_i32 : i32, i32, i32
  }
}

</mosaic_0001>

<bundles_post_ra>
// kernel: tpu_custom_call.1
= control target key start
LH: loop header
LB: loop body
LE: loop exit
PB: predicated region body
PF: predicated region fallthrough
CT: control target
= control target key end

     0   :  { %13 = vsyncpa [#allocation3], 0  ;;  %s2336_s0 = inlined_call_operand.vmem [shape: bf16[2,32,128], index: 0, kind: input, shape index: {}]   ;;  %s2337_s1 = inlined_call_operand.vmem [shape: bf16[2,32,128], index: 1, kind: input, shape index: {}]   ;;  %s2338_s2 = inlined_call_operand.vmem [shape: f32[2,32,1], index: 2, kind: input, shape index: {}]   ;;  %s2339_s3 = inlined_call_operand.vmem [shape: f32[2,32,1], index: 3, kind: input, shape index: {}]   ;;  %s2340_s4 = inlined_call_operand.hbm [shape: bf16[3,128,128], index: 4, kind: input, shape index: {}]   ;;  %s2341_s5 = inlined_call_operand.vmem [shape: f32[1,128], index: 5, kind: input, shape index: {}]   ;;  %s2342_s6 = inlined_call_operand.hbm [shape: bf16[3,128,128], index: 6, kind: input, shape index: {}]   ;;  %s2343_s7 = inlined_call_operand.vmem [shape: f32[1,128], index: 7, kind: input, shape index: {}]   ;;  %s2344_s8 = inlined_call_operand.hbm [shape: f32[2,16,128], index: 8, kind: output, shape index: {}]  }
   0x1   :  { %14 = vsyncpa [#allocation6], 0 }
   0x2   :  { %15 = vsyncpa [#allocation4], 0 }
   0x3   :  { %17 = vsyncpa [#allocation4 + $0x1], 0  ;;  %s2057_s27 = smov 0   ;;  %s2059_s28 = smov 0  }
   0x4   :  { %s2061_s29 = smov 0   ;;  %s2063_s30 = smov 0  }
   0x5   :  { %s2065_s9 = smov 0   ;;  %s2067_s10 = smov 0  }
   0x6 LB: > { %2352 = sst [smem:[#allocation11_spill]] %s1988_s29  ;;  %s1462_s11 = sadd.s32 4294967295, %s2000_s10   ;;  %s2000_s10 = sphi %s2067_s10, %s23_s10   ;;  %s1996_s9 = sphi %s2065_s9, %s2368_s9   ;;  %s1992_s30 = sphi %s2063_s30, %s2371_s30   ;;  %s1988_s29 = sphi %s2061_s29, %s2366_s29   ;;  %s1984_s28 = sphi %s2059_s28, %s2370_s28   ;;  %s1980_s27 = sphi %s2057_s27, %s2369_s27  }
   0x7   : > { %2353 = sst [smem:[#allocation12_spill]] %s1996_s9  ;;  %s1463_s12 = sadd.s32 4294967294, %s2000_s10  }
   0x8   : > { %s35_s13 = sadd.s32 1, %s1996_s9  ;;  %s244_s14 = sadd.s32 1, %s1988_s29 }
   0x9   : > { %p37_p0 = scmp.ge.s32.totalorder %s35_s13, 2  ;;  %p254_p1 = scmp.ne.s32.totalorder %s1988_s29, %s1984_s28 }
   0xa   : > { %p255_p2 = scmp.eq.s32.totalorder %s1462_s11, 1  ;;  %p260_p3 = scmp.ne.s32.totalorder %s1984_s28, %s1980_s27 }
   0xb   : > { %s2373_s13 = smov (%p37_p0, %s35_s13), 0  ;;  %p261_p5 = scmp.eq.s32.totalorder %s1463_s12, 1 }
   0xc   : > { %2354 = sst [smem:[#allocation13_spill]] %s2373_s13  ;;  %p2097_p4 = por %p255_p2, %p254_p1 }
   0xd   : > { %s239_s16 = ssub.s32 %s1996_s9, %s2373_s13  ;;  %p1464_p6 = scmp.ge.s32.totalorder %s2000_s10, 1 }
   0xe   : > { %s2355_s15 = scalar_select %p2097_p4, 1, 0 }
   0xf   : > { %p242_p7 = scmp.eq.s32.totalorder %s239_s16, 0  ;;  %p2104_p8 = por %p261_p5, %p260_p3 }
  0x10   : > { %p268_p9 = scmp.lt.s32.totalorder %s2000_s10, 3  ;;  %p2116_p11 = scmp.eq.s32.totalorder %s1462_s11, 0 }
  0x11   : > { %s2356_s17 = scalar_select %p2104_p8, 1, 0 }
  0x12   : > { %s2110_s18 = scalar_select %p242_p7, %s1988_s29, %s244_s14  }
  0x13   : > { %p2112_p10 = pnand %p1464_p6, %p268_p9  ;;  %s2002_s21 = smov [#allocation2]  }
  0x14   : > { %2357 = sst [smem:[#allocation14_spill]] %s2110_s18  ;;  %s280_s22 = sshll.u32 %s2002_s21, 4  ;;  %s281_s22 = int_to_ptr.vmem [resolvable:$true] %s280_s22 }
  0x15   : > { %s2358_s19 = scalar_select %p2112_p10, 1, 0 }
  0x16   : > { %s2359_s20 = scalar_select %p2116_p11, 1, 0 }
  0x17   : > { %p1733_p12 = pneg %p2112_p10  ;;  %s2003_s24 = smov [#allocation5]  }
  0x18   : > { %s296_s25 = sshll.u32 %s2003_s24, 4  ;;  %s1858_s12 = scalar_lea.hbm %s2340_s4, 3072  ;;  %s2128_s25 = int_to_ptr.vmem [resolvable:$true] %s296_s25 }
  0x19   : > { %p2124_p13 = pnand %p2116_p11, %p1733_p12  ;;  %p1859_p0 = scmp.ne.s32.totalorder %s2340_s4, %s1858_s12 }
  0x1a   : > { %p1865_p5 = scmp.lt.u32.totalorder %s1858_s12, %s2340_s4 }
  0x1b   : > { %p1860_p1 = pneg %p2124_p13 }
  0x1d   : > { %p1861_p2 = pnand %p1860_p1, %p1859_p0 }
  0x1f   : > { %p1862_p3 = pneg %p1861_p2 }
  0x21   : > { %p1867_p6 = pnand %p1865_p5, %p1862_p3 }
  0x23   : > { %1870 = shalt.err (!%p1867_p6)
}
  0x24   : > { %s1871_s24 = scalar_lea.vmem %s281_s22, 3072  ;;  %p1879_p8 = scmp.lt.s32.totalorder %s281_s22, %s281_s22 }
  0x25   : > { %p1872_p7 = scmp.ne.s32.totalorder %s281_s22, %s1871_s24  ;;  %p1880_p4 = scmp.lt.s32.totalorder %s1871_s24, %s1871_s24 }
  0x27   : > { %p1874_p9 = pnand %p1872_p7, %p1860_p1  ;;  %p1881_p11 = por %p1880_p4, %p1879_p8 }
  0x29   : > { %p1875_p12 = pneg %p1874_p9 }
  0x2b   : > { %p1882_p10 = pnand %p1881_p11, %p1875_p12 }
  0x2d   : > { %1885 = shalt.err (!%p1882_p10)
}
  0x2e   : > { %s2004_s26 = smov 64   ;;  %s2005_s11 = smov 4  }
  0x2f   : > { %1736 = dma.hbm_to_vmem [thread:$0]  (!%p2124_p13), %s2340_s4, 3072, %s281_s22, [#allocation3], %s2004_s26, %s2004_s26, %s2005_s11  }
  0x30   : > { %s1886_s21 = scalar_lea.hbm %s2342_s6, 3072 }
  0x31   : > { %p1887_p0 = scmp.ne.s32.totalorder %s2342_s6, %s1886_s21  ;;  %p1893_p10 = scmp.lt.u32.totalorder %s1886_s21, %s2342_s6 }
  0x33   : > { %p1889_p4 = pnand %p1887_p0, %p1860_p1 }
  0x35   : > { %p1890_p8 = pneg %p1889_p4 }
  0x37   : > { %p1895_p11 = pnand %p1893_p10, %p1890_p8 }
  0x39   : > { %1898 = shalt.err (!%p1895_p11)
}
  0x3a   : > { %s1899_s22 = scalar_lea.vmem %s2128_s25, 3072  ;;  %p1907_p6 = scmp.lt.s32.totalorder %s2128_s25, %s2128_s25 }
  0x3b   : > { %p1900_p2 = scmp.ne.s32.totalorder %s2128_s25, %s1899_s22  ;;  %p1908_p7 = scmp.lt.s32.totalorder %s1899_s22, %s1899_s22 }
  0x3d   : > { %p1902_p3 = pnand %p1900_p2, %p1860_p1  ;;  %p1909_p9 = por %p1908_p7, %p1907_p6 }
  0x3f   : > { %p1903_p5 = pneg %p1902_p3 }
  0x41   : > { %p1910_p12 = pnand %p1909_p9, %p1903_p5 }
  0x43   : > { %1913 = shalt.err (!%p1910_p12)
}
  0x44   : > { %1739 = dma.hbm_to_vmem [thread:$0]  (!%p2124_p13), %s2342_s6, 3072, %s2128_s25, [#allocation6], %s2004_s26, %s2004_s26, %s2005_s11  }
  0x45   : > { %p2361_p0 = scmp.ne.s32.totalorder %s2358_s19, 0 }
  0x46   : > { %p2362_p4 = scmp.ne.s32.totalorder (!%p2361_p0), %s2359_s20, 0 }
  0x47   : > { %371 = sbr.rel (%p2361_p0) target bundleno = 763 (0x2fb), region = 52 }
  0x4e   : > { %1967 = dma.done.wait (%p2362_p4), [#allocation3], 3072  }
  0x4f   : > { %1969 = vsyncadd (%p2362_p4), [#allocation3], 4294964224 }
  0x50   : > { %1971 = dma.done.wait (%p2362_p4), [#allocation6], 3072  }
  0x51   : > { %1973 = vsyncadd (%p2362_p4), [#allocation6], 4294964224  ;;  %p443_p1 = scmp.lt.s32.totalorder %s1992_s30, 1  ;;  %v2006_v0 = vmov 0   ;;  %v1808_v1 = vld [vmem:[#allocation2] sm:$0xff]   ;;  %v1809_v6 = vld [vmem:[#allocation2 + $0x8] sm:$0xff]  }
  0x52   : > { %1807 = vset.pattern.permute.xlu1 %v2006_v0  ;;  %1806 = vset.pattern.permute.xlu0 %v2006_v0  ;;  %v1810_v7 = vld [vmem:[#allocation2 + $0x40] sm:$0xff]   ;;  %v1811_v8 = vld [vmem:[#allocation2 + $0x10] sm:$0xff]   ;;  %v1812_v9 = vld [vmem:[#allocation2 + $0x48] sm:$0xff]   ;;  %vm800_vm0 = vcmask 1046528   ;;  %vm1279_vm1 = vcmask 1045504   ;;  %vm2008_vm3 = vmmov 0  }
  0x53   : > { %s2189_s18 = scalar_select %p443_p1, %s1992_s30, 1  ;;  %1623 = vmatprep.subr.bf16.mxu1 %v1808_v1  ;;  %1603 = vmatprep.subr.bf16.mxu0 %v1810_v7  ;;  %v1813_v10 = vld [vmem:[#allocation2 + $0x18] sm:$0xff]   ;;  %v1814_v11 = vld [vmem:[#allocation2 + $0x50] sm:$0xff]   ;;  %v1815_v12 = vld [vmem:[#allocation2 + $0x20] sm:$0xff]   ;;  %vm571_vm2 = vsmask.f32 7424 }
  0x54   : > { %1624 = vmatpush3.bf16.msra.mxu1 %v1808_v1  ;;  %1604 = vmatpush3.bf16.msra.mxu0 %v1810_v7  ;;  %v1816_v13 = vld [vmem:[#allocation2 + $0x58] sm:$0xff]   ;;  %v1817_v14 = vld [vmem:[#allocation2 + $0x28] sm:$0xff]   ;;  %v1818_v15 = vld [vmem:[#allocation2 + $0x60] sm:$0xff]   ;;  %s1543_s21 = sshll.u32 %s1992_s30, 8  ;;  %p2363_p8 = scmp.ne.s32.totalorder %s2355_s15, 0 }
  0x55   : > { %s1540_s19 = sshll.u32 %s2189_s18, 5  ;;  %s1537_s14 = sshll.u32 %s2189_s18, 4  ;;  %1625 = vmatprep.subr.bf16.mxu1 %v1809_v6  ;;  %1605 = vmatprep.subr.bf16.mxu0 %v1812_v9  ;;  %v1821_v16 = vld [vmem:[#allocation2 + $0x30] sm:$0xff]   ;;  %v1822_v17 = vld [vmem:[#allocation2 + $0x68] sm:$0xff]   ;;  %v1823_v18 = vld [vmem:[#allocation2 + $0x38] sm:$0xff]  }
  0x56   : > { %s1542_s23 = sadd.s32 16, %s1540_s19  ;;  %s472_s20 = scalar_lea.vmem %s2338_s2, %s1540_s19  ;;  %v1824_v19 = vld [vmem:[#allocation2 + $0x70] sm:$0xff]   ;;  %v1825_v20 = vld [vmem:[#allocation2 + $0x78] sm:$0xff]   ;;  %v1826_v21 = vld [vmem:[#allocation2 + $0x80] sm:$0xff]  }
  0x57   : > { %s483_s11 = scalar_lea.vmem %s2339_s3, %s1542_s23  ;;  %v490_v3 = vld [vmem:[%s472_s20] sm:$0xff]  ;;  %v491_v5 = vld [vmem:[%s472_s20 + $0x8] sm:$0xff]  ;;  %s2199_s16 = sadd.s32 8, %s1537_s14  ;;  %v1828_v61 = vld [vmem:[#allocation2 + $0x90] sm:$0xff]  }
  0x58   : > { %v506_v2 = vld [vmem:[%s483_s11] sm:$0xff]  ;;  %v507_v4 = vld [vmem:[%s483_s11 + $0x8] sm:$0xff]  ;;  %514 = vperm.xlu0 %1806, %v490_v3   ;;  %1626 = vmatpush3.bf16.msra.mxu1 %v1809_v6  ;;  %s461_s22 = scalar_lea.vmem %s2337_s1, %s2199_s16  ;;  %s2208_s18 = scalar_lea.vmem %s2336_s0, %s1537_s14  ;;  %v1829_v62 = vld [vmem:[#allocation2 + $0x98] sm:$0xff]  }
  0x59   : > { %524 = vperm.xlu1 %1807, %v506_v2   ;;  %1627 = vmatprep.subr.bf16.mxu1 %v1811_v8  ;;  %v1819_v22 = vld [vmem:[%s461_s22] sm:$0xff]   ;;  %v1827_v60 = vld [vmem:[#allocation2 + $0x88] sm:$0xff]   ;;  %v1832_v1 = vld [vmem:[#allocation2 + $0xb0] sm:$0xff]   ;;  %s439_s11 = sand.u32 1, %s1984_s28   ;;  %s2287_s29 = scalar_lea.hbm %s2344_s8, %s1543_s21 }
  0x5a   : > { %1606 = vmatpush3.bf16.msra.mxu0 %v1812_v9  ;;  %v1820_v23 = vld [vmem:[%s2208_s18] sm:$0xff]   ;;  %v510_v25 = vunpack.c.l.bf16 %v1819_v22  ;;  %v511_v28 = vunpack.c.h.bf16 %v1819_v22  ;;  %v1831_v0 = vld [vmem:[#allocation2 + $0xa8] sm:$0xff]   ;;  %v1833_v2 = vld [vmem:[#allocation2 + $0xb8] sm:$0xff]   ;;  %s1471_s13 = sshll.u32 %s439_s11, 4  ;;  %s2290_s9 = scalar_lea.sflag [#allocation4], %s439_s11 }
  0x5b   : > { %1607 = vmatprep.subr.bf16.mxu0 %v1814_v11  ;;  %v508_v27 = vunpack.c.l.bf16 %v1820_v23  ;;  %v509_v29 = vunpack.c.h.bf16 %v1820_v23  ;;  %v1830_v63 = vld [vmem:[#allocation2 + $0xa0] sm:$0xff]   ;;  %v1835_v6 = vld [vmem:[#allocation5 + $0x8] sm:$0xff]   ;;  %v1840_v9 = vld [vmem:[#allocation5 + $0x50] sm:$0xff]   ;;  %s441_s14 = scalar_lea.vmem [#allocation7], %s1471_s13  ;;  %s2009_s18 = smov [#allocation7]  }
  0x5c   : > { %519 = vperm.xlu0 %1806, %v491_v5   ;;  %1628 = vmatpush3.bf16.msra.mxu1 %v1811_v8  ;;  %v1834_v3 = vld [vmem:[#allocation5] sm:$0xff]   ;;  %v2007_v5 = vmov 0.0   ;;  %v1838_v7 = vld [vmem:[#allocation5 + $0x48] sm:$0xff]   ;;  %v1837_v8 = vld [vmem:[#allocation5 + $0x10] sm:$0xff]   ;;  %s1307_s16 = sshll.u32 %s441_s14, 4  ;;  %s1918_s19 = sshll.u32 %s2009_s18, 4  ;;  %s2282_s16 = int_to_ptr.vmem [resolvable:$true] %s1307_s16  ;;  %s1919_s19 = int_to_ptr.vmem [resolvable:$false] %s1918_s19 }
  0x5d   : > { %529 = vperm.xlu1 %1807, %v507_v4   ;;  %1629 = vmatprep.subr.bf16.mxu1 %v1813_v10  ;;  %v1836_v4 = vld [vmem:[#allocation5 + $0x40] sm:$0xff]   ;;  %s1914_s30 = scalar_lea.vmem %s2282_s16, 256  ;;  %s1920_s23 = scalar_lea.vmem %s1919_s19, 512 }
  0x5e   : > { %1608 = vmatpush3.bf16.msra.mxu0 %v1814_v11  ;;  %v1841_v11 = vld [vmem:[#allocation5 + $0x20] sm:$0xff]   ;;  %p1915_p13 = scmp.ne.s32.totalorder %s2282_s16, %s1914_s30  ;;  %p1921_p2 = scmp.lt.s32.totalorder %s2282_s16, %s1919_s19 }
  0x5f   : > { %1609 = vmatprep.subr.bf16.mxu0 %v1816_v13  ;;  %p1922_p3 = scmp.lt.s32.totalorder %s1920_s23, %s1914_s30 }
  0x60   : > { %1630 = vmatpush3.bf16.msra.mxu1 %v1813_v10  ;;  %v1839_v10 = vld [vmem:[#allocation5 + $0x18] sm:$0xff]   ;;  %p1916_p10 = pnand %p1915_p13, %p2363_p8 }
  0x61   : > { %1631 = vmatprep.subr.bf16.mxu1 %v1815_v12  ;;  %p1923_p5 = por %p1922_p3, %p1921_p2 }
  0x62   : > { %1610 = vmatpush3.bf16.msra.mxu0 %v1816_v13  ;;  %v1843_v13 = vld [vmem:[#allocation5 + $0x28] sm:$0xff]   ;;  %p1917_p11 = pneg %p1916_p10 }
  0x63   : > { %1611 = vmatprep.subr.bf16.mxu0 %v1818_v15 }
  0x64   : > { %1632 = vmatpush3.bf16.msra.mxu1 %v1815_v12  ;;  %v1842_v12 = vld [vmem:[#allocation5 + $0x58] sm:$0xff]   ;;  %p1924_p6 = pnand %p1923_p5, %p1917_p11 }
  0x65   : > { %1633 = vmatprep.subr.bf16.mxu1 %v1817_v14 }
  0x66   : > { %1612 = vmatpush3.bf16.msra.mxu0 %v1818_v15  ;;  %v1845_v15 = vld [vmem:[#allocation5 + $0x30] sm:$0xff]  }
  0x67   : > { %1613 = vmatprep.subr.bf16.mxu0 %v1822_v17 }
  0x68   : > { %1634 = vmatpush3.bf16.msra.mxu1 %v1817_v14  ;;  %v1844_v14 = vld [vmem:[#allocation5 + $0x60] sm:$0xff]  }
  0x69   : > { %1635 = vmatprep.subr.bf16.mxu1 %v1821_v16 }
  0x6a   : > { %1614 = vmatpush3.bf16.msra.mxu0 %v1822_v17  ;;  %v1847_v17 = vld [vmem:[#allocation5 + $0x38] sm:$0xff]  }
  0x6b   : > { %1615 = vmatprep.subr.bf16.mxu0 %v1824_v19 }
  0x6c   : > { %1636 = vmatpush3.bf16.msra.mxu1 %v1821_v16  ;;  %v1846_v16 = vld [vmem:[#allocation5 + $0x68] sm:$0xff]  }
  0x6d   : > { %1637 = vmatprep.subr.bf16.mxu1 %v1823_v18 }
  0x6e   : > { %1616 = vmatpush3.bf16.msra.mxu0 %v1824_v19  ;;  %v1849_v19 = vld [vmem:[#allocation5 + $0x78] sm:$0xff]  }
  0x6f   : > { %1617 = vmatprep.subr.bf16.mxu0 %v1825_v20 }
  0x70   : > { %1638 = vmatpush3.bf16.msra.mxu1 %v1823_v18  ;;  %v1848_v18 = vld [vmem:[#allocation5 + $0x70] sm:$0xff]  }
  0x71   : > { %1663 = vmatprep.subr.bf16.mxu1 %v2007_v5 }
  0x72   : > { %1618 = vmatpush3.bf16.msra.mxu0 %v1825_v20 }
  0x73   : > { %1643 = vmatprep.subr.bf16.mxu0 %v1826_v21 }
  0xd7   : > { %v515_v26 = vpop.permute.xlu0 %514 }
  0xd8   : > { %v2216_v24 = vpop.permute.xlu1 %524  ;;  %v532_v32 = vmul.f32 %v515_v26, %v508_v27  ;;  %v919_v33 = vrot.slane %v515_v26, 1  ;;  %v1280_v41 = vrot.slane %v515_v26, 2 }
  0xd9   : > { %v534_v30 = vmul.f32 %v2216_v24, %v510_v25  ;;  %v922_v31 = vrot.slane %v2216_v24, 1  ;;  %v1283_v40 = vrot.slane %v2216_v24, 2  ;;  %v1850_v24 = vld [vmem:[#allocation5 + $0x80] sm:$0xff]  }
  0xdb   : > { %v520_v35 = vpop.permute.xlu0 %519 }
  0xdc   : > { %v530_v34 = vpop.permute.xlu1 %529  ;;  %v533_v37 = vmul.f32 %v520_v35, %v509_v29  ;;  %v920_v38 = vrot.slane %v520_v35, 1  ;;  %v1281_v39 = vrot.slane %v520_v35, 2 }
  0xdd   : > { %v535_v36 = vmul.f32 %v530_v34, %v511_v28  ;;  %v1506_v34 = vld [vmem:[%s2341_s5] ss:$0 sm:$0xff] }
  0xde   : > { %v536_v43 = vpack.c.bf16 %v533_v37, %v532_v32  ;;  %v2222_v44 = vsel %vm800_vm0, %v919_v33, %v920_v38  ;;  %v2227_v45 = vsel %vm800_vm0, %v920_v38, %v922_v31  ;;  %v2230_v46 = vsel %vm1279_vm1, %v1280_v41, %v1281_v39 }
  0xdf   : > { %v537_v42 = vpack.c.bf16 %v535_v36, %v534_v30  ;;  %v2233_v47 = vsel %vm1279_vm1, %v1281_v39, %v1283_v40 }
  0xe0   : > { %1639 = vmatprep.mubr.bf16.mxu1 %v536_v43  ;;  %v575_v48 = vshll.u32 %v536_v43, 16  ;;  %v801_v50 = vrot.slane %v536_v43, 1  ;;  %v573_v52 = vshrl.u32 %v536_v43, 16 }
  0xe1   : > { %v580_v49 = vshll.u32 %v537_v42, 16  ;;  %1640 = vmatmul.mubr.bf16.vlgmr.msra.gmra.mrb[0].mxu1 %v537_v42  ;;  %v802_v51 = vrot.slane %v537_v42, 1  ;;  %v584_v57 = vshrl.u32 %v537_v42, 16 }
  0xe2   : > { %v577_v53 = vrot.slane %v575_v48, 1  ;;  %1664 = vmatpush3.bf16.msra.mxu1 %v1836_v4  ;;  %1679 = vmatprep.mubr.msk.bf16.mxu1 %vm2008_vm3, %v2007_v5  ;;  %v1856_v4 = vld [vmem:[#allocation5 + $0xb0] sm:$0xff]  }
  0xe3   : > { %v582_v54 = vrot.slane %v580_v49, 1  ;;  %v803_v55 = vsel %vm800_vm0, %v801_v50, %v802_v51  ;;  %1665 = vmatprep.subr.bf16.mxu1 %v2007_v5 }
  0xe4   : > { %v578_v56 = vor.u32 %v577_v53, %v573_v52 }
  0xe5   : > { %v586_v59 = vor.u32 %v584_v57, %v582_v54 }
  0xe6   : > { %v583_v58 = vsel %vm571_vm2, %v578_v56, %v582_v54  ;;  %1666 = vmatpush3.bf16.msra.mxu1 %v1838_v7 }
  0xe7   : > { %1619 = vmatprep.mubr.bf16.mxu0 %v583_v58  ;;  %1667 = vmatprep.subr.bf16.mxu1 %v2007_v5 }
  0xe8   : > { %1620 = vmatmul.mubr.bf16.vlgmr.msra.gmra.mrb[0].mxu0 %v586_v59 }
  0xe9   : > { %1644 = vmatpush3.bf16.msra.mxu0 %v1826_v21  ;;  %1659 = vmatprep.mubr.bf16.mxu0 %v803_v55 }
  0xea   : > { %1645 = vmatprep.subr.bf16.mxu0 %v1827_v60  ;;  %1668 = vmatpush3.bf16.msra.mxu1 %v1840_v9 }
  0xeb   : > { %1669 = vmatprep.subr.bf16.mxu1 %v2007_v5 }
  0xed   : > { %1646 = vmatpush3.bf16.msra.mxu0 %v1827_v60 }
  0xee   : > { %1647 = vmatprep.subr.bf16.mxu0 %v1828_v61  ;;  %1670 = vmatpush3.bf16.msra.mxu1 %v1842_v12 }
  0xef   : > { %1671 = vmatprep.subr.bf16.mxu1 %v2007_v5 }
  0xf1   : > { %1648 = vmatpush3.bf16.msra.mxu0 %v1828_v61 }
  0xf2   : > { %1649 = vmatprep.subr.bf16.mxu0 %v1829_v62  ;;  %1672 = vmatpush3.bf16.msra.mxu1 %v1844_v14 }
  0xf3   : > { %1673 = vmatprep.subr.bf16.mxu1 %v2007_v5 }
  0xf5   : > { %1650 = vmatpush3.bf16.msra.mxu0 %v1829_v62 }
  0xf6   : > { %1651 = vmatprep.subr.bf16.mxu0 %v1830_v63  ;;  %1674 = vmatpush3.bf16.msra.mxu1 %v1846_v16 }
  0xf7   : > { %1675 = vmatprep.subr.bf16.mxu1 %v2007_v5 }
  0xf9   : > { %1652 = vmatpush3.bf16.msra.mxu0 %v1830_v63 }
  0xfa   : > { %1653 = vmatprep.subr.bf16.mxu0 %v1831_v0  ;;  %1676 = vmatpush3.bf16.msra.mxu1 %v1848_v18 }
  0xfb   : > { %1677 = vmatprep.subr.bf16.mxu1 %v2007_v5 }
  0xfd   : > { %1654 = vmatpush3.bf16.msra.mxu0 %v1831_v0 }
  0xfe   : > { %1655 = vmatprep.subr.bf16.mxu0 %v1832_v1  ;;  %1678 = vmatpush3.bf16.msra.mxu1 %v1849_v19 }
  0xff   : > { %1703 = vmatprep.subr.bf16.mxu1 %v2007_v5 }
 0x101   : > { %1656 = vmatpush3.bf16.msra.mxu0 %v1832_v1  ;;  %v1853_v1 = vld [vmem:[#allocation5 + $0x98] sm:$0xff]  }
 0x102   : > { %1657 = vmatprep.subr.bf16.mxu0 %v1833_v2 }
 0x105   : > { %1658 = vmatpush3.bf16.msra.mxu0 %v1833_v2  ;;  %v1854_v2 = vld [vmem:[#allocation5 + $0xa0] sm:$0xff]  }
 0x106   : > { %1683 = vmatprep.subr.bf16.mxu0 %v2007_v5 }
 0x108   : > { %1660 = vmatmul.mubr.bf16.vlgmr.msra.gmra.mrb[4].mxu0 %v802_v51 }
 0x109   : > { %1684 = vmatpush3.bf16.msra.mxu0 %v1834_v3  ;;  %1699 = vmatprep.mubr.msk.bf16.mxu0 %vm2008_vm3, %v2007_v5  ;;  %v1855_v3 = vld [vmem:[#allocation5 + $0xa8] sm:$0xff]  }
 0x10a   : > { %1685 = vmatprep.subr.bf16.mxu0 %v2007_v5 }
 0x10d   : > { %1686 = vmatpush3.bf16.msra.mxu0 %v1835_v6  ;;  %v1857_v6 = vld [vmem:[#allocation5 + $0xb8] sm:$0xff]  }
 0x10e   : > { %1687 = vmatprep.subr.bf16.mxu0 %v2007_v5 }
 0x111   : > { %1688 = vmatpush3.bf16.msra.mxu0 %v1837_v8 }
 0x112   : > { %1689 = vmatprep.subr.bf16.mxu0 %v2007_v5 }
 0x115   : > { %1690 = vmatpush3.bf16.msra.mxu0 %v1839_v10 }
 0x116   : > { %1691 = vmatprep.subr.bf16.mxu0 %v2007_v5 }
 0x119   : > { %1692 = vmatpush3.bf16.msra.mxu0 %v1841_v11 }
 0x11a   : > { %1693 = vmatprep.subr.bf16.mxu0 %v2007_v5 }
 0x11d   : > { %1694 = vmatpush3.bf16.msra.mxu0 %v1843_v13 }
 0x11e   : > { %1695 = vmatprep.subr.bf16.mxu0 %v2007_v5 }
 0x121   : > { %1696 = vmatpush3.bf16.msra.mxu0 %v1845_v15 }
 0x122   : > { %1697 = vmatprep.subr.bf16.mxu0 %v2007_v5 }
 0x125   : > { %1698 = vmatpush3.bf16.msra.mxu0 %v1847_v17 }
 0x1b4   : > { %v1641_v20 = vpop.f32.mrb[0].mxu1 }
 0x1b5   : > { %v767_v21 = vpop.f32.mrb[1].mxu1 }
 0x1b6   : > { %v1642_v22 = vpop.f32.mrb[2].mxu1 }
 0x1b7   : > { %v770_v23 = vpop.f32.mrb[3].mxu1 }
 0x1bb   : > { %v1621_v25 = vpop.f32.mrb[0].mxu0 }
 0x1bc   : > { %v776_v26 = vadd.f32 %v1641_v20, %v1621_v25  ;;  %v671_v27 = vpop.f32.mrb[1].mxu0 }
 0x1bd   : > { %v768_v28 = vadd.f32 %v767_v21, %v671_v27  ;;  %v1622_v29 = vpop.f32.mrb[2].mxu0 }
 0x1be   : > { %v674_v30 = vpop.f32.mrb[3].mxu0 }
 0x1bf   : > { %v771_v32 = vadd.f32 %v770_v23, %v674_v30 }
 0x1db   : > { %v1661_v33 = vpop.f32.mrb[4].mxu0 }
 0x1dc   : > { %v904_v35 = vadd.f32 %v1661_v33, %v776_v26  ;;  %v888_v36 = vpop.f32.mrb[5].mxu0 }
 0x1dd   : > { %v902_v37 = vadd.f32 %v888_v36, %v768_v28  ;;  %v1662_v38 = vpop.f32.mrb[6].mxu0 }
 0x1de   : > { %v914_v39 = vadd.f32 %v1506_v34, %v904_v35  ;;  %v891_v40 = vpop.f32.mrb[7].mxu0 }
 0x1df   : > { %v912_v41 = vadd.f32 %v1506_v34, %v902_v37  ;;  %v903_v42 = vadd.f32 %v891_v40, %v771_v32 }
 0x1e0   : > { %v917_v43 = vmax.f32 %v914_v39, 0.0 }
 0x1e1   : > { %v915_v48 = vmax.f32 %v912_v41, 0.0  ;;  %v913_v49 = vadd.f32 %v1506_v34, %v903_v42 }
 0x1e2   : > { %v929_v50 = vmul.f32 %v922_v31, %v917_v43 }
 0x1e3   : > { %v927_v51 = vmul.f32 %v2222_v44, %v915_v48  ;;  %v916_v52 = vmax.f32 %v913_v49, 0.0  ;;  %v1851_v44 = vld [vmem:[#allocation5 + $0x88] sm:$0xff]  }
 0x1e4   : > { %v931_v53 = vpack.c.bf16 %v929_v50, %v929_v50 }
 0x1e5   : > { %v928_v54 = vmul.f32 %v2227_v45, %v916_v52  ;;  %v1852_v45 = vld [vmem:[#allocation5 + $0x90] sm:$0xff]  }
 0x1e6   : > { %v973_v56 = vshll.u32 %v931_v53, 16  ;;  %v1176_v57 = vrot.slane %v931_v53, 1 }
 0x1e7   : > { %v930_v55 = vpack.c.bf16 %v928_v54, %v927_v51 }
 0x1e8   : > { %v975_v0 = vrot.slane %v973_v56, 1 }
 0x1e9   : > { %1700 = vmatmul.mubr.bf16.vlgmr.msra.gmra.mrb[8].mxu0 %v930_v55  ;;  %v968_v58 = vshll.u32 %v930_v55, 16  ;;  %v1175_v59 = vrot.slane %v930_v55, 1  ;;  %v966_v60 = vshrl.u32 %v930_v55, 16 }
 0x1eb   : > { %v970_v61 = vrot.slane %v968_v58, 1  ;;  %v1177_v62 = vsel %vm800_vm0, %v1175_v59, %v1176_v57 }
 0x1ed   : > { %v971_v63 = vor.u32 %v970_v61, %v966_v60 }
 0x1ef   : > { %v976_v31 = vsel %vm571_vm2, %v971_v63, %v975_v0 }
 0x1f0   : > { %1680 = vmatmul.mubr.bf16.vlgmr.msra.gmra.mrb[4].mxu1 %v976_v31 }
 0x1f1   : > { %1704 = vmatpush3.bf16.msra.mxu1 %v1850_v24  ;;  %1719 = vmatprep.mubr.msk.bf16.mxu1 %vm2008_vm3, %v2007_v5 }
 0x1f2   : > { %1705 = vmatprep.subr.bf16.mxu1 %v2007_v5 }
 0x1f5   : > { %1706 = vmatpush3.bf16.msra.mxu1 %v1851_v44 }
 0x1f6   : > { %1707 = vmatprep.subr.bf16.mxu1 %v2007_v5 }
 0x1f9   : > { %1708 = vmatpush3.bf16.msra.mxu1 %v1852_v45 }
 0x1fa   : > { %1709 = vmatprep.subr.bf16.mxu1 %v2007_v5 }
 0x1fd   : > { %1710 = vmatpush3.bf16.msra.mxu1 %v1853_v1 }
 0x1fe   : > { %1711 = vmatprep.subr.bf16.mxu1 %v2007_v5 }
 0x201   : > { %1712 = vmatpush3.bf16.msra.mxu1 %v1854_v2 }
 0x202   : > { %1713 = vmatprep.subr.bf16.mxu1 %v2007_v5 }
 0x205   : > { %1714 = vmatpush3.bf16.msra.mxu1 %v1855_v3 }
 0x206   : > { %1715 = vmatprep.subr.bf16.mxu1 %v2007_v5 }
 0x209   : > { %1716 = vmatpush3.bf16.msra.mxu1 %v1856_v4 }
 0x20a   : > { %1717 = vmatprep.subr.bf16.mxu1 %v2007_v5  ;;  %v1531_v5 = vld [vmem:[%s2343_s7] ss:$0 sm:$0xff] }
 0x20d   : > { %1718 = vmatpush3.bf16.msra.mxu1 %v1857_v6 }
 0x210   : > { %1720 = vmatmul.mubr.bf16.vlgmr.msra.gmra.mrb[8].mxu1 %v1177_v62 }
 0x2bc   : > { %v1149_v7 = vpop.f32.mrb[8].mxu0 }
 0x2bd   : > { %v1701_v8 = vpop.f32.mrb[9].mxu0 }
 0x2be   : > { %v1152_v9 = vpop.f32.mrb[10].mxu0 }
 0x2bf   : > { %v1702_v10 = vpop.f32.mrb[11].mxu0 }
 0x2c3   : > { %v1060_v11 = vpop.f32.mrb[4].mxu1 }
 0x2c4   : > { %v1150_v12 = vadd.f32 %v1149_v7, %v1060_v11  ;;  %v1681_v13 = vpop.f32.mrb[5].mxu1 }
 0x2c5   : > { %v1063_v14 = vpop.f32.mrb[6].mxu1 }
 0x2c6   : > { %v1153_v15 = vadd.f32 %v1152_v9, %v1063_v14  ;;  %v1682_v16 = vpop.f32.mrb[7].mxu1 }
 0x2e3   : > { %v1261_v17 = vpop.f32.mrb[8].mxu1 }
 0x2e4   : > { %v1268_v18 = vadd.f32 %v1261_v17, %v1150_v12  ;;  %v1721_v19 = vpop.f32.mrb[9].mxu1 }
 0x2e5   : > { %v1264_v20 = vpop.f32.mrb[10].mxu1 }
 0x2e6   : > { %v1277_v21 = vadd.f32 %v1531_v5, %v1268_v18  ;;  %v1269_v22 = vadd.f32 %v1264_v20, %v1153_v15  ;;  %v1722_v23 = vpop.f32.mrb[11].mxu1 }
 0x2e8   : > { %v1287_v25 = vmul.f32 %v2230_v46, %v1277_v21  ;;  %v1278_v26 = vadd.f32 %v1531_v5, %v1269_v22 }
 0x2ea   : > { %1289 = vst [vmem:[%s441_s14] sm:$0xff] %v1287_v25  ;;  %v1288_v27 = vmul.f32 %v2233_v47, %v1278_v26 }
 0x2ec   : > { %1290 = vst [vmem:[%s441_s14 + $0x8] sm:$0xff] %v1288_v27 }
 0x2ed   : > { %1927 = shalt.err (!%p1924_p6)
}
 0x2ee   : > { %s1928_s25 = scalar_lea.hbm %s2287_s29, 256  ;;  %s1932_s13 = scalar_lea.hbm %s2344_s8, 512 }
 0x2ef   : > { %p1929_p7 = scmp.ne.s32.totalorder %s2287_s29, %s1928_s25  ;;  %p1933_p0 = scmp.lt.u32.totalorder %s2287_s29, %s2344_s8 }
 0x2f0   : > { %p1934_p4 = scmp.lt.u32.totalorder %s1932_s13, %s1928_s25  ;;  %p1936_p13 = scmp.lt.u32.totalorder %s1928_s25, %s2287_s29 }
 0x2f1   : > { %p1930_p9 = pnand %p1929_p7, %p2363_p8 }
 0x2f2   : > { %p1935_p1 = por %p1934_p4, %p1933_p0 }
 0x2f3   : > { %p1931_p12 = pneg %p1930_p9 }
 0x2f4   : > { %p1937_p10 = por %p1936_p13, %p1935_p1 }
 0x2f6   : > { %p1938_p11 = pnand %p1937_p10, %p1931_p12 }
 0x2f8   : > { %1941 = shalt.err (!%p1938_p11)
}
 0x2f9   : > { %s2010_s14 = smov 128   ;;  %s2011_s21 = smov 8  }
 0x2fa   : > { %1731 = dma.vmem_to_hbm [thread:$0]  (%p2363_p8), %s2282_s16, 256, %s2287_s29, %s2290_s9, %s2010_s14, %s2010_s14, %s2011_s21  }
 0x2fb PF: > { %p1748_p2 = scmp.ge.s32.totalorder %s2000_s10, 2  ;;  %s1322_s24 = sand.u32 1, %s1980_s27  }
 0x2fc   : > { %p2364_p3 = scmp.ne.s32.totalorder %s2356_s17, 0  ;;  %s1323_s22 = scalar_lea.sflag [#allocation4], %s1322_s24 }
 0x2fe   : > { %p1741_p5 = pnand %p1748_p2, %p2364_p3 }
 0x300   : > { %1975 = dma.done.wait (!%p1741_p5), %s1323_s22, 256  }
 0x301   : > { %1977 = vsyncadd (!%p1741_p5), %s1323_s22, 4294967040  ;;  %s23_s10 = sadd.s32 1, %s2000_s10   ;;  %s2365_s30 = sld [smem:[#allocation11_spill]] }
 0x302   : > { %p20_p6 = scmp.ge.s32.totalorder %s23_s10, 4   ;;  %s2366_s29 = sld [smem:[#allocation14_spill]] }
 0x303   : > { %s2367_s18 = sld [smem:[#allocation12_spill]]  ;;  %s2368_s9 = sld [smem:[#allocation13_spill]] }
 0x304   : > { %s2369_s27 = smov %s1984_s28  ;;  %22 = sbr.rel (!%p20_p6) target bundleno = 6 (0x6), region = 109 }
 0x307   : > { %s2370_s28 = smov %s2365_s30 }
 0x309   : > { %s2371_s30 = smov %s2367_s18 }
 0x30b   :  { %1328 = vsyncpa [#allocation3], 1 }
 0x30c   :  { %1330 = vsyncpa [#allocation3 + $0x1], 1 }
 0x30d   :  { %1331 = vsyncpa [#allocation6], 1 }
 0x30e   :  { %1332 = vsyncpa [#allocation4], 1 }
 0x30f   :  { %1334 = vsyncpa [#allocation4 + $0x1], 1 }

// kernel: tpu_custom_call.1
= control target key start
LH: loop header
LB: loop body
LE: loop exit
PB: predicated region body
PF: predicated region fallthrough
CT: control target
= control target key end

     0   :  { %13 = vsyncpa [#allocation3], 0  ;;  %s2336_s0 = inlined_call_operand.vmem [shape: bf16[2,32,128], index: 0, kind: input, shape index: {}]   ;;  %s2337_s1 = inlined_call_operand.vmem [shape: bf16[2,32,128], index: 1, kind: input, shape index: {}]   ;;  %s2338_s2 = inlined_call_operand.vmem [shape: f32[2,32,1], index: 2, kind: input, shape index: {}]   ;;  %s2339_s3 = inlined_call_operand.vmem [shape: f32[2,32,1], index: 3, kind: input, shape index: {}]   ;;  %s2340_s4 = inlined_call_operand.hbm [shape: bf16[3,128,128], index: 4, kind: input, shape index: {}]   ;;  %s2341_s5 = inlined_call_operand.vmem [shape: f32[1,128], index: 5, kind: input, shape index: {}]   ;;  %s2342_s6 = inlined_call_operand.hbm [shape: bf16[3,128,128], index: 6, kind: input, shape index: {}]   ;;  %s2343_s7 = inlined_call_operand.vmem [shape: f32[1,128], index: 7, kind: input, shape index: {}]   ;;  %s2344_s8 = inlined_call_operand.hbm [shape: f32[2,16,128], index: 8, kind: output, shape index: {}]  }
   0x1   :  { %14 = vsyncpa [#allocation6], 0 }
   0x2   :  { %15 = vsyncpa [#allocation4], 0 }
   0x3   :  { %17 = vsyncpa [#allocation4 + $0x1], 0  ;;  %s2057_s27 = smov 0   ;;  %s2059_s28 = smov 0  }
   0x4   :  { %s2061_s29 = smov 0   ;;  %s2063_s30 = smov 0  }
   0x5   :  { %s2065_s9 = smov 0   ;;  %s2067_s10 = smov 0  }
   0x6 LB: > { %2352 = sst [smem:[#allocation11_spill]] %s1988_s29  ;;  %s1462_s11 = sadd.s32 4294967295, %s2000_s10   ;;  %s2000_s10 = sphi %s2067_s10, %s23_s10   ;;  %s1996_s9 = sphi %s2065_s9, %s2368_s9   ;;  %s1992_s30 = sphi %s2063_s30, %s2371_s30   ;;  %s1988_s29 = sphi %s2061_s29, %s2366_s29   ;;  %s1984_s28 = sphi %s2059_s28, %s2370_s28   ;;  %s1980_s27 = sphi %s2057_s27, %s2369_s27  }
   0x7   : > { %2353 = sst [smem:[#allocation12_spill]] %s1996_s9  ;;  %s1463_s12 = sadd.s32 4294967294, %s2000_s10  }
   0x8   : > { %s35_s13 = sadd.s32 1, %s1996_s9  ;;  %s244_s14 = sadd.s32 1, %s1988_s29 }
   0x9   : > { %p37_p0 = scmp.ge.s32.totalorder %s35_s13, 2  ;;  %p254_p1 = scmp.ne.s32.totalorder %s1988_s29, %s1984_s28 }
   0xa   : > { %p255_p2 = scmp.eq.s32.totalorder %s1462_s11, 1  ;;  %p260_p3 = scmp.ne.s32.totalorder %s1984_s28, %s1980_s27 }
   0xb   : > { %s2373_s13 = smov (%p37_p0, %s35_s13), 0  ;;  %p261_p5 = scmp.eq.s32.totalorder %s1463_s12, 1 }
   0xc   : > { %2354 = sst [smem:[#allocation13_spill]] %s2373_s13  ;;  %p2097_p4 = por %p255_p2, %p254_p1 }
   0xd   : > { %s239_s16 = ssub.s32 %s1996_s9, %s2373_s13  ;;  %p1464_p6 = scmp.ge.s32.totalorder %s2000_s10, 1 }
   0xe   : > { %s2355_s15 = scalar_select %p2097_p4, 1, 0 }
   0xf   : > { %p242_p7 = scmp.eq.s32.totalorder %s239_s16, 0  ;;  %p2104_p8 = por %p261_p5, %p260_p3 }
  0x10   : > { %p268_p9 = scmp.lt.s32.totalorder %s2000_s10, 3  ;;  %p2116_p11 = scmp.eq.s32.totalorder %s1462_s11, 0 }
  0x11   : > { %s2356_s17 = scalar_select %p2104_p8, 1, 0 }
  0x12   : > { %s2110_s18 = scalar_select %p242_p7, %s1988_s29, %s244_s14  }
  0x13   : > { %p2112_p10 = pnand %p1464_p6, %p268_p9  ;;  %s2002_s21 = smov [#allocation2]  }
  0x14   : > { %2357 = sst [smem:[#allocation14_spill]] %s2110_s18  ;;  %s280_s22 = sshll.u32 %s2002_s21, 4  ;;  %s281_s22 = int_to_ptr.vmem [resolvable:$true] %s280_s22 }
  0x15   : > { %s2358_s19 = scalar_select %p2112_p10, 1, 0 }
  0x16   : > { %s2359_s20 = scalar_select %p2116_p11, 1, 0 }
  0x17   : > { %p1733_p12 = pneg %p2112_p10  ;;  %s2003_s24 = smov [#allocation5]  }
  0x18   : > { %s296_s25 = sshll.u32 %s2003_s24, 4  ;;  %s1858_s12 = scalar_lea.hbm %s2340_s4, 3072  ;;  %s2128_s25 = int_to_ptr.vmem [resolvable:$true] %s296_s25 }
  0x19   : > { %p2124_p13 = pnand %p2116_p11, %p1733_p12  ;;  %p1859_p0 = scmp.ne.s32.totalorder %s2340_s4, %s1858_s12 }
  0x1a   : > { %p1865_p5 = scmp.lt.u32.totalorder %s1858_s12, %s2340_s4 }
  0x1b   : > { %p1860_p1 = pneg %p2124_p13 }
  0x1d   : > { %p1861_p2 = pnand %p1860_p1, %p1859_p0 }
  0x1f   : > { %p1862_p3 = pneg %p1861_p2 }
  0x21   : > { %p1867_p6 = pnand %p1865_p5, %p1862_p3 }
  0x23   : > { %1870 = shalt.err (!%p1867_p6)
}
  0x24   : > { %s1871_s24 = scalar_lea.vmem %s281_s22, 3072  ;;  %p1879_p8 = scmp.lt.s32.totalorder %s281_s22, %s281_s22 }
  0x25   : > { %p1872_p7 = scmp.ne.s32.totalorder %s281_s22, %s1871_s24  ;;  %p1880_p4 = scmp.lt.s32.totalorder %s1871_s24, %s1871_s24 }
  0x27   : > { %p1874_p9 = pnand %p1872_p7, %p1860_p1  ;;  %p1881_p11 = por %p1880_p4, %p1879_p8 }
  0x29   : > { %p1875_p12 = pneg %p1874_p9 }
  0x2b   : > { %p1882_p10 = pnand %p1881_p11, %p1875_p12 }
  0x2d   : > { %1885 = shalt.err (!%p1882_p10)
}
  0x2e   : > { %s2004_s26 = smov 64   ;;  %s2005_s11 = smov 4  }
  0x2f   : > { %1736 = dma.hbm_to_vmem [thread:$0]  (!%p2124_p13), %s2340_s4, 3072, %s281_s22, [#allocation3], %s2004_s26, %s2004_s26, %s2005_s11  }
  0x30   : > { %s1886_s21 = scalar_lea.hbm %s2342_s6, 3072 }
  0x31   : > { %p1887_p0 = scmp.ne.s32.totalorder %s2342_s6, %s1886_s21  ;;  %p1893_p10 = scmp.lt.u32.totalorder %s1886_s21, %s2342_s6 }
  0x33   : > { %p1889_p4 = pnand %p1887_p0, %p1860_p1 }
  0x35   : > { %p1890_p8 = pneg %p1889_p4 }
  0x37   : > { %p1895_p11 = pnand %p1893_p10, %p1890_p8 }
  0x39   : > { %1898 = shalt.err (!%p1895_p11)
}
  0x3a   : > { %s1899_s22 = scalar_lea.vmem %s2128_s25, 3072  ;;  %p1907_p6 = scmp.lt.s32.totalorder %s2128_s25, %s2128_s25 }
  0x3b   : > { %p1900_p2 = scmp.ne.s32.totalorder %s2128_s25, %s1899_s22  ;;  %p1908_p7 = scmp.lt.s32.totalorder %s1899_s22, %s1899_s22 }
  0x3d   : > { %p1902_p3 = pnand %p1900_p2, %p1860_p1  ;;  %p1909_p9 = por %p1908_p7, %p1907_p6 }
  0x3f   : > { %p1903_p5 = pneg %p1902_p3 }
  0x41   : > { %p1910_p12 = pnand %p1909_p9, %p1903_p5 }
  0x43   : > { %1913 = shalt.err (!%p1910_p12)
}
  0x44   : > { %1739 = dma.hbm_to_vmem [thread:$0]  (!%p2124_p13), %s2342_s6, 3072, %s2128_s25, [#allocation6], %s2004_s26, %s2004_s26, %s2005_s11  }
  0x45   : > { %p2361_p0 = scmp.ne.s32.totalorder %s2358_s19, 0 }
  0x46   : > { %p2362_p4 = scmp.ne.s32.totalorder (!%p2361_p0), %s2359_s20, 0 }
  0x47   : > { %371 = sbr.rel (%p2361_p0) target bundleno = 763 (0x2fb), region = 52 }
  0x4e   : > { %1967 = dma.done.wait (%p2362_p4), [#allocation3], 3072  }
  0x4f   : > { %1969 = vsyncadd (%p2362_p4), [#allocation3], 4294964224 }
  0x50   : > { %1971 = dma.done.wait (%p2362_p4), [#allocation6], 3072  }
  0x51   : > { %1973 = vsyncadd (%p2362_p4), [#allocation6], 4294964224  ;;  %p443_p1 = scmp.lt.s32.totalorder %s1992_s30, 1  ;;  %v2006_v0 = vmov 0   ;;  %v1808_v1 = vld [vmem:[#allocation2] sm:$0xff]   ;;  %v1809_v6 = vld [vmem:[#allocation2 + $0x8] sm:$0xff]  }
  0x52   : > { %1807 = vset.pattern.permute.xlu1 %v2006_v0  ;;  %1806 = vset.pattern.permute.xlu0 %v2006_v0  ;;  %v1810_v7 = vld [vmem:[#allocation2 + $0x40] sm:$0xff]   ;;  %v1811_v8 = vld [vmem:[#allocation2 + $0x10] sm:$0xff]   ;;  %v1812_v9 = vld [vmem:[#allocation2 + $0x48] sm:$0xff]   ;;  %vm800_vm0 = vcmask 1046528   ;;  %vm1279_vm1 = vcmask 1045504   ;;  %vm2008_vm3 = vmmov 0  }
  0x53   : > { %s2189_s18 = scalar_select %p443_p1, %s1992_s30, 1  ;;  %1623 = vmatprep.subr.bf16.mxu1 %v1808_v1  ;;  %1603 = vmatprep.subr.bf16.mxu0 %v1810_v7  ;;  %v1813_v10 = vld [vmem:[#allocation2 + $0x18] sm:$0xff]   ;;  %v1814_v11 = vld [vmem:[#allocation2 + $0x50] sm:$0xff]   ;;  %v1815_v12 = vld [vmem:[#allocation2 + $0x20] sm:$0xff]   ;;  %vm571_vm2 = vsmask.f32 7424 }
  0x54   : > { %1624 = vmatpush3.bf16.msra.mxu1 %v1808_v1  ;;  %1604 = vmatpush3.bf16.msra.mxu0 %v1810_v7  ;;  %v1816_v13 = vld [vmem:[#allocation2 + $0x58] sm:$0xff]   ;;  %v1817_v14 = vld [vmem:[#allocation2 + $0x28] sm:$0xff]   ;;  %v1818_v15 = vld [vmem:[#allocation2 + $0x60] sm:$0xff]   ;;  %s1543_s21 = sshll.u32 %s1992_s30, 8  ;;  %p2363_p8 = scmp.ne.s32.totalorder %s2355_s15, 0 }
  0x55   : > { %s1540_s19 = sshll.u32 %s2189_s18, 5  ;;  %s1537_s14 = sshll.u32 %s2189_s18, 4  ;;  %1625 = vmatprep.subr.bf16.mxu1 %v1809_v6  ;;  %1605 = vmatprep.subr.bf16.mxu0 %v1812_v9  ;;  %v1821_v16 = vld [vmem:[#allocation2 + $0x30] sm:$0xff]   ;;  %v1822_v17 = vld [vmem:[#allocation2 + $0x68] sm:$0xff]   ;;  %v1823_v18 = vld [vmem:[#allocation2 + $0x38] sm:$0xff]  }
  0x56   : > { %s1542_s23 = sadd.s32 16, %s1540_s19  ;;  %s472_s20 = scalar_lea.vmem %s2338_s2, %s1540_s19  ;;  %v1824_v19 = vld [vmem:[#allocation2 + $0x70] sm:$0xff]   ;;  %v1825_v20 = vld [vmem:[#allocation2 + $0x78] sm:$0xff]   ;;  %v1826_v21 = vld [vmem:[#allocation2 + $0x80] sm:$0xff]  }
  0x57   : > { %s483_s11 = scalar_lea.vmem %s2339_s3, %s1542_s23  ;;  %v490_v3 = vld [vmem:[%s472_s20] sm:$0xff]  ;;  %v491_v5 = vld [vmem:[%s472_s20 + $0x8] sm:$0xff]  ;;  %s2199_s16 = sadd.s32 8, %s1537_s14  ;;  %v1828_v61 = vld [vmem:[#allocation2 + $0x90] sm:$0xff]  }
  0x58   : > { %v506_v2 = vld [vmem:[%s483_s11] sm:$0xff]  ;;  %v507_v4 = vld [vmem:[%s483_s11 + $0x8] sm:$0xff]  ;;  %514 = vperm.xlu0 %1806, %v490_v3   ;;  %1626 = vmatpush3.bf16.msra.mxu1 %v1809_v6  ;;  %s461_s22 = scalar_lea.vmem %s2337_s1, %s2199_s16  ;;  %s2208_s18 = scalar_lea.vmem %s2336_s0, %s1537_s14  ;;  %v1829_v62 = vld [vmem:[#allocation2 + $0x98] sm:$0xff]  }
  0x59   : > { %524 = vperm.xlu1 %1807, %v506_v2   ;;  %1627 = vmatprep.subr.bf16.mxu1 %v1811_v8  ;;  %v1819_v22 = vld [vmem:[%s461_s22] sm:$0xff]   ;;  %v1827_v60 = vld [vmem:[#allocation2 + $0x88] sm:$0xff]   ;;  %v1832_v1 = vld [vmem:[#allocation2 + $0xb0] sm:$0xff]   ;;  %s439_s11 = sand.u32 1, %s1984_s28   ;;  %s2287_s29 = scalar_lea.hbm %s2344_s8, %s1543_s21 }
  0x5a   : > { %1606 = vmatpush3.bf16.msra.mxu0 %v1812_v9  ;;  %v1820_v23 = vld [vmem:[%s2208_s18] sm:$0xff]   ;;  %v510_v25 = vunpack.c.l.bf16 %v1819_v22  ;;  %v511_v28 = vunpack.c.h.bf16 %v1819_v22  ;;  %v1831_v0 = vld [vmem:[#allocation2 + $0xa8] sm:$0xff]   ;;  %v1833_v2 = vld [vmem:[#allocation2 + $0xb8] sm:$0xff]   ;;  %s1471_s13 = sshll.u32 %s439_s11, 4  ;;  %s2290_s9 = scalar_lea.sflag [#allocation4], %s439_s11 }
  0x5b   : > { %1607 = vmatprep.subr.bf16.mxu0 %v1814_v11  ;;  %v508_v27 = vunpack.c.l.bf16 %v1820_v23  ;;  %v509_v29 = vunpack.c.h.bf16 %v1820_v23  ;;  %v1830_v63 = vld [vmem:[#allocation2 + $0xa0] sm:$0xff]   ;;  %v1835_v6 = vld [vmem:[#allocation5 + $0x8] sm:$0xff]   ;;  %v1840_v9 = vld [vmem:[#allocation5 + $0x50] sm:$0xff]   ;;  %s441_s14 = scalar_lea.vmem [#allocation7], %s1471_s13  ;;  %s2009_s18 = smov [#allocation7]  }
  0x5c   : > { %519 = vperm.xlu0 %1806, %v491_v5   ;;  %1628 = vmatpush3.bf16.msra.mxu1 %v1811_v8  ;;  %v1834_v3 = vld [vmem:[#allocation5] sm:$0xff]   ;;  %v2007_v5 = vmov 0.0   ;;  %v1838_v7 = vld [vmem:[#allocation5 + $0x48] sm:$0xff]   ;;  %v1837_v8 = vld [vmem:[#allocation5 + $0x10] sm:$0xff]   ;;  %s1307_s16 = sshll.u32 %s441_s14, 4  ;;  %s1918_s19 = sshll.u32 %s2009_s18, 4  ;;  %s2282_s16 = int_to_ptr.vmem [resolvable:$true] %s1307_s16  ;;  %s1919_s19 = int_to_ptr.vmem [resolvable:$false] %s1918_s19 }
  0x5d   : > { %529 = vperm.xlu1 %1807, %v507_v4   ;;  %1629 = vmatprep.subr.bf16.mxu1 %v1813_v10  ;;  %v1836_v4 = vld [vmem:[#allocation5 + $0x40] sm:$0xff]   ;;  %s1914_s30 = scalar_lea.vmem %s2282_s16, 256  ;;  %s1920_s23 = scalar_lea.vmem %s1919_s19, 512 }
  0x5e   : > { %1608 = vmatpush3.bf16.msra.mxu0 %v1814_v11  ;;  %v1841_v11 = vld [vmem:[#allocation5 + $0x20] sm:$0xff]   ;;  %p1915_p13 = scmp.ne.s32.totalorder %s2282_s16, %s1914_s30  ;;  %p1921_p2 = scmp.lt.s32.totalorder %s2282_s16, %s1919_s19 }
  0x5f   : > { %1609 = vmatprep.subr.bf16.mxu0 %v1816_v13  ;;  %p1922_p3 = scmp.lt.s32.totalorder %s1920_s23, %s1914_s30 }
  0x60   : > { %1630 = vmatpush3.bf16.msra.mxu1 %v1813_v10  ;;  %v1839_v10 = vld [vmem:[#allocation5 + $0x18] sm:$0xff]   ;;  %p1916_p10 = pnand %p1915_p13, %p2363_p8 }
  0x61   : > { %1631 = vmatprep.subr.bf16.mxu1 %v1815_v12  ;;  %p1923_p5 = por %p1922_p3, %p1921_p2 }
  0x62   : > { %1610 = vmatpush3.bf16.msra.mxu0 %v1816_v13  ;;  %v1843_v13 = vld [vmem:[#allocation5 + $0x28] sm:$0xff]   ;;  %p1917_p11 = pneg %p1916_p10 }
  0x63   : > { %1611 = vmatprep.subr.bf16.mxu0 %v1818_v15 }
  0x64   : > { %1632 = vmatpush3.bf16.msra.mxu1 %v1815_v12  ;;  %v1842_v12 = vld [vmem:[#allocation5 + $0x58] sm:$0xff]   ;;  %p1924_p6 = pnand %p1923_p5, %p1917_p11 }
  0x65   : > { %1633 = vmatprep.subr.bf16.mxu1 %v1817_v14 }
  0x66   : > { %1612 = vmatpush3.bf16.msra.mxu0 %v1818_v15  ;;  %v1845_v15 = vld [vmem:[#allocation5 + $0x30] sm:$0xff]  }
  0x67   : > { %1613 = vmatprep.subr.bf16.mxu0 %v1822_v17 }
  0x68   : > { %1634 = vmatpush3.bf16.msra.mxu1 %v1817_v14  ;;  %v1844_v14 = vld [vmem:[#allocation5 + $0x60] sm:$0xff]  }
  0x69   : > { %1635 = vmatprep.subr.bf16.mxu1 %v1821_v16 }
  0x6a   : > { %1614 = vmatpush3.bf16.msra.mxu0 %v1822_v17  ;;  %v1847_v17 = vld [vmem:[#allocation5 + $0x38] sm:$0xff]  }
  0x6b   : > { %1615 = vmatprep.subr.bf16.mxu0 %v1824_v19 }
  0x6c   : > { %1636 = vmatpush3.bf16.msra.mxu1 %v1821_v16  ;;  %v1846_v16 = vld [vmem:[#allocation5 + $0x68] sm:$0xff]  }
  0x6d   : > { %1637 = vmatprep.subr.bf16.mxu1 %v1823_v18 }
  0x6e   : > { %1616 = vmatpush3.bf16.msra.mxu0 %v1824_v19  ;;  %v1849_v19 = vld [vmem:[#allocation5 + $0x78] sm:$0xff]  }
  0x6f   : > { %1617 = vmatprep.subr.bf16.mxu0 %v1825_v20 }
  0x70   : > { %1638 = vmatpush3.bf16.msra.mxu1 %v1823_v18  ;;  %v1848_v18 = vld [vmem:[#allocation5 + $0x70] sm:$0xff]  }
  0x71   : > { %1663 = vmatprep.subr.bf16.mxu1 %v2007_v5 }
  0x72   : > { %1618 = vmatpush3.bf16.msra.mxu0 %v1825_v20 }
  0x73   : > { %1643 = vmatprep.subr.bf16.mxu0 %v1826_v21 }
  0xd7   : > { %v515_v26 = vpop.permute.xlu0 %514 }
  0xd8   : > { %v2216_v24 = vpop.permute.xlu1 %524  ;;  %v532_v32 = vmul.f32 %v515_v26, %v508_v27  ;;  %v919_v33 = vrot.slane %v515_v26, 1  ;;  %v1280_v41 = vrot.slane %v515_v26, 2 }
  0xd9   : > { %v534_v30 = vmul.f32 %v2216_v24, %v510_v25  ;;  %v922_v31 = vrot.slane %v2216_v24, 1  ;;  %v1283_v40 = vrot.slane %v2216_v24, 2  ;;  %v1850_v24 = vld [vmem:[#allocation5 + $0x80] sm:$0xff]  }
  0xdb   : > { %v520_v35 = vpop.permute.xlu0 %519 }
  0xdc   : > { %v530_v34 = vpop.permute.xlu1 %529  ;;  %v533_v37 = vmul.f32 %v520_v35, %v509_v29  ;;  %v920_v38 = vrot.slane %v520_v35, 1  ;;  %v1281_v39 = vrot.slane %v520_v35, 2 }
  0xdd   : > { %v535_v36 = vmul.f32 %v530_v34, %v511_v28  ;;  %v1506_v34 = vld [vmem:[%s2341_s5] ss:$0 sm:$0xff] }
  0xde   : > { %v536_v43 = vpack.c.bf16 %v533_v37, %v532_v32  ;;  %v2222_v44 = vsel %vm800_vm0, %v919_v33, %v920_v38  ;;  %v2227_v45 = vsel %vm800_vm0, %v920_v38, %v922_v31  ;;  %v2230_v46 = vsel %vm1279_vm1, %v1280_v41, %v1281_v39 }
  0xdf   : > { %v537_v42 = vpack.c.bf16 %v535_v36, %v534_v30  ;;  %v2233_v47 = vsel %vm1279_vm1, %v1281_v39, %v1283_v40 }
  0xe0   : > { %1639 = vmatprep.mubr.bf16.mxu1 %v536_v43  ;;  %v575_v48 = vshll.u32 %v536_v43, 16  ;;  %v801_v50 = vrot.slane %v536_v43, 1  ;;  %v573_v52 = vshrl.u32 %v536_v43, 16 }
  0xe1   : > { %v580_v49 = vshll.u32 %v537_v42, 16  ;;  %1640 = vmatmul.mubr.bf16.vlgmr.msra.gmra.mrb[0].mxu1 %v537_v42  ;;  %v802_v51 = vrot.slane %v537_v42, 1  ;;  %v584_v57 = vshrl.u32 %v537_v42, 16 }
  0xe2   : > { %v577_v53 = vrot.slane %v575_v48, 1  ;;  %1664 = vmatpush3.bf16.msra.mxu1 %v1836_v4  ;;  %1679 = vmatprep.mubr.msk.bf16.mxu1 %vm2008_vm3, %v2007_v5  ;;  %v1856_v4 = vld [vmem:[#allocation5 + $0xb0] sm:$0xff]  }
  0xe3   : > { %v582_v54 = vrot.slane %v580_v49, 1  ;;  %v803_v55 = vsel %vm800_vm0, %v801_v50, %v802_v51  ;;  %1665 = vmatprep.subr.bf16.mxu1 %v2007_v5 }
  0xe4   : > { %v578_v56 = vor.u32 %v577_v53, %v573_v52 }
  0xe5   : > { %v586_v59 = vor.u32 %v584_v57, %v582_v54 }
  0xe6   : > { %v583_v58 = vsel %vm571_vm2, %v578_v56, %v582_v54  ;;  %1666 = vmatpush3.bf16.msra.mxu1 %v1838_v7 }
  0xe7   : > { %1619 = vmatprep.mubr.bf16.mxu0 %v583_v58  ;;  %1667 = vmatprep.subr.bf16.mxu1 %v2007_v5 }
  0xe8   : > { %1620 = vmatmul.mubr.bf16.vlgmr.msra.gmra.mrb[0].mxu0 %v586_v59 }
  0xe9   : > { %1644 = vmatpush3.bf16.msra.mxu0 %v1826_v21  ;;  %1659 = vmatprep.mubr.bf16.mxu0 %v803_v55 }
  0xea   : > { %1645 = vmatprep.subr.bf16.mxu0 %v1827_v60  ;;  %1668 = vmatpush3.bf16.msra.mxu1 %v1840_v9 }
  0xeb   : > { %1669 = vmatprep.subr.bf16.mxu1 %v2007_v5 }
  0xed   : > { %1646 = vmatpush3.bf16.msra.mxu0 %v1827_v60 }
  0xee   : > { %1647 = vmatprep.subr.bf16.mxu0 %v1828_v61  ;;  %1670 = vmatpush3.bf16.msra.mxu1 %v1842_v12 }
  0xef   : > { %1671 = vmatprep.subr.bf16.mxu1 %v2007_v5 }
  0xf1   : > { %1648 = vmatpush3.bf16.msra.mxu0 %v1828_v61 }
  0xf2   : > { %1649 = vmatprep.subr.bf16.mxu0 %v1829_v62  ;;  %1672 = vmatpush3.bf16.msra.mxu1 %v1844_v14 }
  0xf3   : > { %1673 = vmatprep.subr.bf16.mxu1 %v2007_v5 }
  0xf5   : > { %1650 = vmatpush3.bf16.msra.mxu0 %v1829_v62 }
  0xf6   : > { %1651 = vmatprep.subr.bf16.mxu0 %v1830_v63  ;;  %1674 = vmatpush3.bf16.msra.mxu1 %v1846_v16 }
  0xf7   : > { %1675 = vmatprep.subr.bf16.mxu1 %v2007_v5 }
  0xf9   : > { %1652 = vmatpush3.bf16.msra.mxu0 %v1830_v63 }
  0xfa   : > { %1653 = vmatprep.subr.bf16.mxu0 %v1831_v0  ;;  %1676 = vmatpush3.bf16.msra.mxu1 %v1848_v18 }
  0xfb   : > { %1677 = vmatprep.subr.bf16.mxu1 %v2007_v5 }
  0xfd   : > { %1654 = vmatpush3.bf16.msra.mxu0 %v1831_v0 }
  0xfe   : > { %1655 = vmatprep.subr.bf16.mxu0 %v1832_v1  ;;  %1678 = vmatpush3.bf16.msra.mxu1 %v1849_v19 }
  0xff   : > { %1703 = vmatprep.subr.bf16.mxu1 %v2007_v5 }
 0x101   : > { %1656 = vmatpush3.bf16.msra.mxu0 %v1832_v1  ;;  %v1853_v1 = vld [vmem:[#allocation5 + $0x98] sm:$0xff]  }
 0x102   : > { %1657 = vmatprep.subr.bf16.mxu0 %v1833_v2 }
 0x105   : > { %1658 = vmatpush3.bf16.msra.mxu0 %v1833_v2  ;;  %v1854_v2 = vld [vmem:[#allocation5 + $0xa0] sm:$0xff]  }
 0x106   : > { %1683 = vmatprep.subr.bf16.mxu0 %v2007_v5 }
 0x108   : > { %1660 = vmatmul.mubr.bf16.vlgmr.msra.gmra.mrb[4].mxu0 %v802_v51 }
 0x109   : > { %1684 = vmatpush3.bf16.msra.mxu0 %v1834_v3  ;;  %1699 = vmatprep.mubr.msk.bf16.mxu0 %vm2008_vm3, %v2007_v5  ;;  %v1855_v3 = vld [vmem:[#allocation5 + $0xa8] sm:$0xff]  }
 0x10a   : > { %1685 = vmatprep.subr.bf16.mxu0 %v2007_v5 }
 0x10d   : > { %1686 = vmatpush3.bf16.msra.mxu0 %v1835_v6  ;;  %v1857_v6 = vld [vmem:[#allocation5 + $0xb8] sm:$0xff]  }
 0x10e   : > { %1687 = vmatprep.subr.bf16.mxu0 %v2007_v5 }
 0x111   : > { %1688 = vmatpush3.bf16.msra.mxu0 %v1837_v8 }
 0x112   : > { %1689 = vmatprep.subr.bf16.mxu0 %v2007_v5 }
 0x115   : > { %1690 = vmatpush3.bf16.msra.mxu0 %v1839_v10 }
 0x116   : > { %1691 = vmatprep.subr.bf16.mxu0 %v2007_v5 }
 0x119   : > { %1692 = vmatpush3.bf16.msra.mxu0 %v1841_v11 }
 0x11a   : > { %1693 = vmatprep.subr.bf16.mxu0 %v2007_v5 }
 0x11d   : > { %1694 = vmatpush3.bf16.msra.mxu0 %v1843_v13 }
 0x11e   : > { %1695 = vmatprep.subr.bf16.mxu0 %v2007_v5 }
 0x121   : > { %1696 = vmatpush3.bf16.msra.mxu0 %v1845_v15 }
 0x122   : > { %1697 = vmatprep.subr.bf16.mxu0 %v2007_v5 }
 0x125   : > { %1698 = vmatpush3.bf16.msra.mxu0 %v1847_v17 }
 0x1b4   : > { %v1641_v20 = vpop.f32.mrb[0].mxu1 }
 0x1b5   : > { %v767_v21 = vpop.f32.mrb[1].mxu1 }
 0x1b6   : > { %v1642_v22 = vpop.f32.mrb[2].mxu1 }
 0x1b7   : > { %v770_v23 = vpop.f32.mrb[3].mxu1 }
 0x1bb   : > { %v1621_v25 = vpop.f32.mrb[0].mxu0 }
 0x1bc   : > { %v776_v26 = vadd.f32 %v1641_v20, %v1621_v25  ;;  %v671_v27 = vpop.f32.mrb[1].mxu0 }
 0x1bd   : > { %v768_v28 = vadd.f32 %v767_v21, %v671_v27  ;;  %v1622_v29 = vpop.f32.mrb[2].mxu0 }
 0x1be   : > { %v674_v30 = vpop.f32.mrb[3].mxu0 }
 0x1bf   : > { %v771_v32 = vadd.f32 %v770_v23, %v674_v30 }
 0x1db   : > { %v1661_v33 = vpop.f32.mrb[4].mxu0 }
 0x1dc   : > { %v904_v35 = vadd.f32 %v1661_v33, %v776_v26  ;;  %v888_v36 = vpop.f32.mrb[5].mxu0 }
 0x1dd   : > { %v902_v37 = vadd.f32 %v888_v36, %v768_v28  ;;  %v1662_v38 = vpop.f32.mrb[6].mxu0 }
 0x1de   : > { %v914_v39 = vadd.f32 %v1506_v34, %v904_v35  ;;  %v891_v40 = vpop.f32.mrb[7].mxu0 }
 0x1df   : > { %v912_v41 = vadd.f32 %v1506_v34, %v902_v37  ;;  %v903_v42 = vadd.f32 %v891_v40, %v771_v32 }
 0x1e0   : > { %v917_v43 = vmax.f32 %v914_v39, 0.0 }
 0x1e1   : > { %v915_v48 = vmax.f32 %v912_v41, 0.0  ;;  %v913_v49 = vadd.f32 %v1506_v34, %v903_v42 }
 0x1e2   : > { %v929_v50 = vmul.f32 %v922_v31, %v917_v43 }
 0x1e3   : > { %v927_v51 = vmul.f32 %v2222_v44, %v915_v48  ;;  %v916_v52 = vmax.f32 %v913_v49, 0.0  ;;  %v1851_v44 = vld [vmem:[#allocation5 + $0x88] sm:$0xff]  }
 0x1e4   : > { %v931_v53 = vpack.c.bf16 %v929_v50, %v929_v50 }
 0x1e5   : > { %v928_v54 = vmul.f32 %v2227_v45, %v916_v52  ;;  %v1852_v45 = vld [vmem:[#allocation5 + $0x90] sm:$0xff]  }
 0x1e6   : > { %v973_v56 = vshll.u32 %v931_v53, 16  ;;  %v1176_v57 = vrot.slane %v931_v53, 1 }
 0x1e7   : > { %v930_v55 = vpack.c.bf16 %v928_v54, %v927_v51 }
 0x1e8   : > { %v975_v0 = vrot.slane %v973_v56, 1 }
 0x1e9   : > { %1700 = vmatmul.mubr.bf16.vlgmr.msra.gmra.mrb[8].mxu0 %v930_v55  ;;  %v968_v58 = vshll.u32 %v930_v55, 16  ;;  %v1175_v59 = vrot.slane %v930_v55, 1  ;;  %v966_v60 = vshrl.u32 %v930_v55, 16 }
 0x1eb   : > { %v970_v61 = vrot.slane %v968_v58, 1  ;;  %v1177_v62 = vsel %vm800_vm0, %v1175_v59, %v1176_v57 }
 0x1ed   : > { %v971_v63 = vor.u32 %v970_v61, %v966_v60 }
 0x1ef   : > { %v976_v31 = vsel %vm571_vm2, %v971_v63, %v975_v0 }
 0x1f0   : > { %1680 = vmatmul.mubr.bf16.vlgmr.msra.gmra.mrb[4].mxu1 %v976_v31 }
 0x1f1   : > { %1704 = vmatpush3.bf16.msra.mxu1 %v1850_v24  ;;  %1719 = vmatprep.mubr.msk.bf16.mxu1 %vm2008_vm3, %v2007_v5 }
 0x1f2   : > { %1705 = vmatprep.subr.bf16.mxu1 %v2007_v5 }
 0x1f5   : > { %1706 = vmatpush3.bf16.msra.mxu1 %v1851_v44 }
 0x1f6   : > { %1707 = vmatprep.subr.bf16.mxu1 %v2007_v5 }
 0x1f9   : > { %1708 = vmatpush3.bf16.msra.mxu1 %v1852_v45 }
 0x1fa   : > { %1709 = vmatprep.subr.bf16.mxu1 %v2007_v5 }
 0x1fd   : > { %1710 = vmatpush3.bf16.msra.mxu1 %v1853_v1 }
 0x1fe   : > { %1711 = vmatprep.subr.bf16.mxu1 %v2007_v5 }
 0x201   : > { %1712 = vmatpush3.bf16.msra.mxu1 %v1854_v2 }
 0x202   : > { %1713 = vmatprep.subr.bf16.mxu1 %v2007_v5 }
 0x205   : > { %1714 = vmatpush3.bf16.msra.mxu1 %v1855_v3 }
 0x206   : > { %1715 = vmatprep.subr.bf16.mxu1 %v2007_v5 }
 0x209   : > { %1716 = vmatpush3.bf16.msra.mxu1 %v1856_v4 }
 0x20a   : > { %1717 = vmatprep.subr.bf16.mxu1 %v2007_v5  ;;  %v1531_v5 = vld [vmem:[%s2343_s7] ss:$0 sm:$0xff] }
 0x20d   : > { %1718 = vmatpush3.bf16.msra.mxu1 %v1857_v6 }
 0x210   : > { %1720 = vmatmul.mubr.bf16.vlgmr.msra.gmra.mrb[8].mxu1 %v1177_v62 }
 0x2bc   : > { %v1149_v7 = vpop.f32.mrb[8].mxu0 }
 0x2bd   : > { %v1701_v8 = vpop.f32.mrb[9].mxu0 }
 0x2be   : > { %v1152_v9 = vpop.f32.mrb[10].mxu0 }
 0x2bf   : > { %v1702_v10 = vpop.f32.mrb[11].mxu0 }
 0x2c3   : > { %v1060_v11 = vpop.f32.mrb[4].mxu1 }
 0x2c4   : > { %v1150_v12 = vadd.f32 %v1149_v7, %v1060_v11  ;;  %v1681_v13 = vpop.f32.mrb[5].mxu1 }
 0x2c5   : > { %v1063_v14 = vpop.f32.mrb[6].mxu1 }
 0x2c6   : > { %v1153_v15 = vadd.f32 %v1152_v9, %v1063_v14  ;;  %v1682_v16 = vpop.f32.mrb[7].mxu1 }
 0x2e3   : > { %v1261_v17 = vpop.f32.mrb[8].mxu1 }
 0x2e4   : > { %v1268_v18 = vadd.f32 %v1261_v17, %v1150_v12  ;;  %v1721_v19 = vpop.f32.mrb[9].mxu1 }
 0x2e5   : > { %v1264_v20 = vpop.f32.mrb[10].mxu1 }
 0x2e6   : > { %v1277_v21 = vadd.f32 %v1531_v5, %v1268_v18  ;;  %v1269_v22 = vadd.f32 %v1264_v20, %v1153_v15  ;;  %v1722_v23 = vpop.f32.mrb[11].mxu1 }
 0x2e8   : > { %v1287_v25 = vmul.f32 %v2230_v46, %v1277_v21  ;;  %v1278_v26 = vadd.f32 %v1531_v5, %v1269_v22 }
 0x2ea   : > { %1289 = vst [vmem:[%s441_s14] sm:$0xff] %v1287_v25  ;;  %v1288_v27 = vmul.f32 %v2233_v47, %v1278_v26 }
 0x2ec   : > { %1290 = vst [vmem:[%s441_s14 + $0x8] sm:$0xff] %v1288_v27 }
 0x2ed   : > { %1927 = shalt.err (!%p1924_p6)
}
 0x2ee   : > { %s1928_s25 = scalar_lea.hbm %s2287_s29, 256  ;;  %s1932_s13 = scalar_lea.hbm %s2344_s8, 512 }
 0x2ef   : > { %p1929_p7 = scmp.ne.s32.totalorder %s2287_s29, %s1928_s25  ;;  %p1933_p0 = scmp.lt.u32.totalorder %s2287_s29, %s2344_s8 }
 0x2f0   : > { %p1934_p4 = scmp.lt.u32.totalorder %s1932_s13, %s1928_s25  ;;  %p1936_p13 = scmp.lt.u32.totalorder %s1928_s25, %s2287_s29 }
 0x2f1   : > { %p1930_p9 = pnand %p1929_p7, %p2363_p8 }
 0x2f2   : > { %p1935_p1 = por %p1934_p4, %p1933_p0 }
 0x2f3   : > { %p1931_p12 = pneg %p1930_p9 }
 0x2f4   : > { %p1937_p10 = por %p1936_p13, %p1935_p1 }
 0x2f6   : > { %p1938_p11 = pnand %p1937_p10, %p1931_p12 }
 0x2f8   : > { %1941 = shalt.err (!%p1938_p11)
}
 0x2f9   : > { %s2010_s14 = smov 128   ;;  %s2011_s21 = smov 8  }
 0x2fa   : > { %1731 = dma.vmem_to_hbm [thread:$0]  (%p2363_p8), %s2282_s16, 256, %s2287_s29, %s2290_s9, %s2010_s14, %s2010_s14, %s2011_s21  }
 0x2fb PF: > { %p1748_p2 = scmp.ge.s32.totalorder %s2000_s10, 2  ;;  %s1322_s24 = sand.u32 1, %s1980_s27  }
 0x2fc   : > { %p2364_p3 = scmp.ne.s32.totalorder %s2356_s17, 0  ;;  %s1323_s22 = scalar_lea.sflag [#allocation4], %s1322_s24 }
 0x2fe   : > { %p1741_p5 = pnand %p1748_p2, %p2364_p3 }
 0x300   : > { %1975 = dma.done.wait (!%p1741_p5), %s1323_s22, 256  }
 0x301   : > { %1977 = vsyncadd (!%p1741_p5), %s1323_s22, 4294967040  ;;  %s23_s10 = sadd.s32 1, %s2000_s10   ;;  %s2365_s30 = sld [smem:[#allocation11_spill]] }
 0x302   : > { %p20_p6 = scmp.ge.s32.totalorder %s23_s10, 4   ;;  %s2366_s29 = sld [smem:[#allocation14_spill]] }
 0x303   : > { %s2367_s18 = sld [smem:[#allocation12_spill]]  ;;  %s2368_s9 = sld [smem:[#allocation13_spill]] }
 0x304   : > { %s2369_s27 = smov %s1984_s28  ;;  %22 = sbr.rel (!%p20_p6) target bundleno = 6 (0x6), region = 109 }
 0x307   : > { %s2370_s28 = smov %s2365_s30 }
 0x309   : > { %s2371_s30 = smov %s2367_s18 }
 0x30b   :  { %1328 = vsyncpa [#allocation3], 1 }
 0x30c   :  { %1330 = vsyncpa [#allocation3 + $0x1], 1 }
 0x30d   :  { %1331 = vsyncpa [#allocation6], 1 }
 0x30e   :  { %1332 = vsyncpa [#allocation4], 1 }
 0x30f   :  { %1334 = vsyncpa [#allocation4 + $0x1], 1 }

</bundles_post_ra>
